<compile_context>
chip_gen: v5e
topology: v5e:2x2
jax: 0.10.0
libtpu: 0.0.40
codegen_flags: <defaults>
</compile_context>

<pallas_src>
import functools

import jax
import jax.numpy as jnp
from jax import lax
from jax.experimental import pallas as pl
from jax.experimental.pallas import tpu as pltpu

EPS = 1e-5                    # PyTorch BatchNorm2d default eps (training-mode batch stats)
MXU_DTYPE = jnp.bfloat16      # matmul-input / intermediate dtype (f32 accumulation)
TILE_M = 512                  # rows of the (N*Ho*Wo, K) GEMM per grid step
LANE = 128                    # lane width; channel dim is padded to a multiple of this


def _round_up(x, m):
    return (x + m - 1) // m * m


def _cparams():
    return pltpu.CompilerParams(
        dimension_semantics=("parallel",),   # v7x: shard row tiles across both TCs
        vmem_limit_bytes=48 * 1024 * 1024,   # > 32 MiB default, < v7x 64 MiB physical
    )


# ---------------------------------------------------------------------------
# Kernels.  All GEMMs: bf16 LHS/RHS, f32 accumulation; epilogues in f32.
# Stats refs hold per-tile [sum; sum_sq] rows of shape (2, Cp).
# ---------------------------------------------------------------------------
def _gemm_stats_kernel(p_ref, w_ref, y_ref, s_ref):
    """y = p @ w; write y tile plus per-tile [sum, sum_sq] partials."""
    y = jnp.dot(p_ref[...], w_ref[...], preferred_element_type=jnp.float32)
    y_ref[...] = y.astype(y_ref.dtype)
    s_ref[0:1, :] = jnp.sum(y, axis=0, keepdims=True)
    s_ref[1:2, :] = jnp.sum(y * y, axis=0, keepdims=True)


def _conv_sc_stats_kernel(p_ref, xs_ref, w_ref, wsc_ref, y_ref, s_ref, ssc_ref):
    """conv1 GEMM + stats, plus shortcut 1x1 GEMM *stats only* (its output is
    recomputed in the final kernel instead of round-tripping through HBM)."""
    y = jnp.dot(p_ref[...], w_ref[...], preferred_element_type=jnp.float32)
    y_ref[...] = y.astype(y_ref.dtype)
    s_ref[0:1, :] = jnp.sum(y, axis=0, keepdims=True)
    s_ref[1:2, :] = jnp.sum(y * y, axis=0, keepdims=True)
    ysc = jnp.dot(xs_ref[...], wsc_ref[...], preferred_element_type=jnp.float32)
    ssc_ref[0:1, :] = jnp.sum(ysc, axis=0, keepdims=True)
    ssc_ref[1:2, :] = jnp.sum(ysc * ysc, axis=0, keepdims=True)


def _bn_relu_kernel(y_ref, c_ref, o_ref):
    """o = relu(y * scale + shift); f32 element-wise math."""
    y = y_ref[...].astype(jnp.float32)
    o_ref[...] = jnp.maximum(y * c_ref[0:1, :] + c_ref[1:2, :], 0.0).astype(o_ref.dtype)


def _final_proj_kernel(y2_ref, xs_ref, wsc_ref, c2_ref, csc_ref, o_ref):
    """out = relu(bn2(y2) + bn_sc(xs @ wsc)); shortcut GEMM recomputed here (cheap
    MXU work that hides under slack) instead of reading a materialized residual."""
    y2 = y2_ref[...].astype(jnp.float32)
    ysc = jnp.dot(xs_ref[...], wsc_ref[...], preferred_element_type=jnp.float32)
    out = (y2 * c2_ref[0:1, :] + c2_ref[1:2, :]
           + ysc * csc_ref[0:1, :] + csc_ref[1:2, :])
    o_ref[...] = jnp.maximum(out, 0.0)


def _final_id_kernel(y2_ref, r_ref, c2_ref, o_ref):
    out = y2_ref[...].astype(jnp.float32) * c2_ref[0:1, :] + c2_ref[1:2, :] + r_ref[...]
    o_ref[...] = jnp.maximum(out, 0.0)


# ---------------------------------------------------------------------------
# Spec helpers
# ---------------------------------------------------------------------------
def _row_spec(tm, k):
    return pl.BlockSpec((tm, k), lambda i: (i, 0))


def _full_spec(shape):
    nd = len(shape)
    return pl.BlockSpec(shape, lambda i: (0,) * nd)


def _stats_spec(cp):
    return pl.BlockSpec((None, 2, cp), lambda i: (i, 0, 0))


# ---------------------------------------------------------------------------
# JAX glue
# ---------------------------------------------------------------------------
def _im2col(x_nhwc, k, stride, pad):
    """Extract (k,k) patches -> (N*Ho*Wo, k*k*C).  K order = (i, j, c)."""
    n, h, w, c = x_nhwc.shape
    xp = jnp.pad(x_nhwc, ((0, 0), (pad, pad), (pad, pad), (0, 0)))
    ho = (h + 2 * pad - k) // stride + 1
    wo = (w + 2 * pad - k) // stride + 1
    cols = []
    for i in range(k):
        for j in range(k):
            cols.append(xp[:, i:i + stride * ho:stride, j:j + stride * wo:stride, :])
    p = jnp.stack(cols, axis=3)                      # (N, Ho, Wo, k*k, C)
    return p.reshape(n * ho * wo, k * k * c), ho, wo


def _pad_rows(a, mp):
    return jnp.pad(a, ((0, mp - a.shape[0]), (0, 0)))


def _fold_bn(stats, gamma_p, beta_p, m_true):
    """Reduce per-tile [sum, sum_sq] partials -> per-channel (scale, shift)."""
    tot = jnp.sum(stats, axis=0)                                   # (2, Cp)
    mean = tot[0] / m_true
    var = jnp.maximum(tot[1] / m_true - mean * mean, 0.0)          # biased var
    scale = gamma_p * lax.rsqrt(var + EPS)
    shift = beta_p - mean * scale
    return jnp.stack([scale, shift], axis=0)                       # (2, Cp) f32


@functools.partial(jax.jit, static_argnames=("stride", "tile_m"))
def residual_block(x_nchw, params, stride, tile_m=TILE_M):
    x = jnp.transpose(x_nchw, (0, 2, 3, 1)).astype(jnp.float32)    # NHWC
    n, h, w, cin = x.shape
    w1, w2 = params["w1"], params["w2"]
    cout = w1.shape[-1]
    cp = _round_up(cout, LANE)                                     # lane-dense channels
    ho = (h + 2 - 3) // stride + 1
    wo = (w + 2 - 3) // stride + 1
    m = n * ho * wo
    tm = min(tile_m, _round_up(m, 16))
    mp = _round_up(m, tm)
    nt = mp // tm
    proj = (cin != cout) or (stride != 1)

    xbf = x.astype(MXU_DTYPE)

    # weights / BN params padded to Cp (output channels lane-dense), cast for the MXU
    w1m = jnp.pad(w1, ((0, 0), (0, 0), (0, 0), (0, cp - cout))
                  ).reshape(9 * cin, cp).astype(MXU_DTYPE)
    w2m = jnp.pad(w2, ((0, 0), (0, 0), (0, cp - cout), (0, cp - cout))
                  ).reshape(9 * cp, cp).astype(MXU_DTYPE)
    g1 = jnp.pad(params["g1"], (0, cp - cout))
    b1 = jnp.pad(params["b1"], (0, cp - cout))
    g2 = jnp.pad(params["g2"], (0, cp - cout))
    b2 = jnp.pad(params["b2"], (0, cp - cout))

    cparams = _cparams()
    grid = (nt,)
    y_shape = jax.ShapeDtypeStruct((mp, cp), MXU_DTYPE)
    stats_shape = jax.ShapeDtypeStruct((nt, 2, cp), jnp.float32)

    # ---- conv1 GEMM (+ shortcut GEMM stats) --------------------------------
    p1, _, _ = _im2col(xbf, 3, stride, 1)                          # (m, 9*cin) bf16
    p1 = _pad_rows(p1, mp)                                         # zero rows -> no stat bias

    if proj:
        xs = _pad_rows(xbf[:, ::stride, ::stride, :].reshape(m, cin), mp)
        wscm = jnp.pad(params["wsc"], ((0, 0), (0, cp - cout))).astype(MXU_DTYPE)
        gsc = jnp.pad(params["gsc"], (0, cp - cout))
        bsc = jnp.pad(params["bsc"], (0, cp - cout))
        y1, s1, ssc = pl.pallas_call(
            _conv_sc_stats_kernel,
            out_shape=(y_shape, stats_shape, stats_shape),
            grid=grid,
            in_specs=[_row_spec(tm, 9 * cin), _row_spec(tm, cin),
                      _full_spec((9 * cin, cp)), _full_spec((cin, cp))],
            out_specs=(_row_spec(tm, cp), _stats_spec(cp), _stats_spec(cp)),
            compiler_params=cparams,
        )(p1, xs, w1m, wscm)
        csc = _fold_bn(ssc, gsc, bsc, m)
    else:
        y1, s1 = pl.pallas_call(
            _gemm_stats_kernel,
            out_shape=(y_shape, stats_shape),
            grid=grid,
            in_specs=[_row_spec(tm, 9 * cin), _full_spec((9 * cin, cp))],
            out_specs=(_row_spec(tm, cp), _stats_spec(cp)),
            compiler_params=cparams,
        )(p1, w1m)
    c1 = _fold_bn(s1, g1, b1, m)

    # ---- bn1 + relu (global batch stats, applied tiled) --------------------
    a1 = pl.pallas_call(
        _bn_relu_kernel,
        out_shape=jax.ShapeDtypeStruct((mp, cp), MXU_DTYPE),
        grid=grid,
        in_specs=[_row_spec(tm, cp), _full_spec((2, cp))],
        out_specs=_row_spec(tm, cp),
        compiler_params=cparams,
    )(y1, c1)

    # ---- conv2 GEMM + stats -------------------------------------------------
    # TODO(synk): replace this materialized im2col with an in-kernel 9-tap
    # accumulation over haloed NHWC tiles to avoid the 9x patch expansion.
    p2, _, _ = _im2col(a1[:m].reshape(n, ho, wo, cp), 3, 1, 1)     # (m, 9*cp) bf16
    p2 = _pad_rows(p2, mp)
    y2, s2 = pl.pallas_call(
        _gemm_stats_kernel,
        out_shape=(y_shape, stats_shape),
        grid=grid,
        in_specs=[_row_spec(tm, 9 * cp), _full_spec((9 * cp, cp))],
        out_specs=(_row_spec(tm, cp), _stats_spec(cp)),
        compiler_params=cparams,
    )(p2, w2m)
    c2 = _fold_bn(s2, g2, b2, m)

    # ---- bn2 + shortcut (recomputed / identity) + relu ----------------------
    out_shape = jax.ShapeDtypeStruct((mp, cp), jnp.float32)
    if proj:
        out = pl.pallas_call(
            _final_proj_kernel,
            out_shape=out_shape,
            grid=grid,
            in_specs=[_row_spec(tm, cp), _row_spec(tm, cin),
                      _full_spec((cin, cp)), _full_spec((2, cp)), _full_spec((2, cp))],
            out_specs=_row_spec(tm, cp),
            compiler_params=cparams,
        )(y2, xs, wscm, c2, csc)
    else:
        r = _pad_rows(jnp.pad(x.reshape(m, cin), ((0, 0), (0, cp - cin))), mp)
        out = pl.pallas_call(
            _final_id_kernel,
            out_shape=out_shape,
            grid=grid,
            in_specs=[_row_spec(tm, cp), _row_spec(tm, cp), _full_spec((2, cp))],
            out_specs=_row_spec(tm, cp),
            compiler_params=cparams,
        )(y2, r, c2)

    out = out[:m, :cout].reshape(n, ho, wo, cout)
    return jnp.transpose(out, (0, 3, 1, 2))                        # back to NCHW


# ---------------------------------------------------------------------------
# Pure-JAX f32 reference (lax.conv) for correctness check
# ---------------------------------------------------------------------------
def residual_block_ref(x_nchw, params, stride):
    x = jnp.transpose(x_nchw, (0, 2, 3, 1)).astype(jnp.float32)
    cin, cout = params["w1"].shape[2], params["w1"].shape[3]

    def conv(inp, wgt, s, pad):
        return lax.conv_general_dilated(
            inp, wgt, (s, s), ((pad, pad), (pad, pad)),
            dimension_numbers=("NHWC", "HWIO", "NHWC"))

    def bn(y, g, b):
        mu = jnp.mean(y, axis=(0, 1, 2), keepdims=True)
        va = jnp.mean(jnp.square(y - mu), axis=(0, 1, 2), keepdims=True)
        return (y - mu) * lax.rsqrt(va + EPS) * g + b

    if cin != cout or stride != 1:
        res = bn(conv(x, params["wsc"][None, None], stride, 0),
                 params["gsc"], params["bsc"])
    else:
        res = x
    out = jnp.maximum(bn(conv(x, params["w1"], stride, 1),
                         params["g1"], params["b1"]), 0.0)
    out = bn(conv(out, params["w2"], 1, 1), params["g2"], params["b2"])
    out = jnp.maximum(out + res, 0.0)
    return jnp.transpose(out, (0, 3, 1, 2))


# ---------------------------------------------------------------------------
if __name__ == "__main__":
    N, CIN, COUT, H, W, STRIDE = 2, 4, 8, 16, 16, 2

    key = jax.random.PRNGKey(0)
    ks = jax.random.split(key, 10)
    params = {
        "w1":  0.2 * jax.random.normal(ks[0], (3, 3, CIN, COUT), jnp.float32),
        "w2":  0.2 * jax.random.normal(ks[1], (3, 3, COUT, COUT), jnp.float32),
        "wsc": 0.2 * jax.random.normal(ks[2], (CIN, COUT), jnp.float32),
        "g1":  1.0 + 0.1 * jax.random.normal(ks[3], (COUT,), jnp.float32),
        "b1":  0.1 * jax.random.normal(ks[4], (COUT,), jnp.float32),
        "g2":  1.0 + 0.1 * jax.random.normal(ks[5], (COUT,), jnp.float32),
        "b2":  0.1 * jax.random.normal(ks[6], (COUT,), jnp.float32),
        "gsc": 1.0 + 0.1 * jax.random.normal(ks[7], (COUT,), jnp.float32),
        "bsc": 0.1 * jax.random.normal(ks[8], (COUT,), jnp.float32),
    }
    x = jax.random.normal(ks[9], (N, CIN, H, W), jnp.float32)

    out = jax.block_until_ready(residual_block(x, params, STRIDE))
    ref = jax.block_until_ready(residual_block_ref(x, params, STRIDE))

    assert out.shape == (N, COUT, H // STRIDE, W // STRIDE), out.shape
    # Tolerances account for bf16 MXU inputs (f32 accumulation) vs the f32
    # reference; structural bugs would produce O(1) errors.
    err = jnp.abs(out - ref)
    assert float(jnp.mean(err)) < 2e-2, float(jnp.mean(err))
    assert float(jnp.max(err)) < 1e-1, float(jnp.max(err))
    print("KERNEL_OK")
</pallas_src>

<mosaic_0001>
module attributes {stable_mosaic.version = 11 : i64} {
  func.func @_conv_sc_stats_kernel(%arg0: i32, %arg1: memref<128x36xbf16, #tpu.memory_space<vmem>>, %arg2: memref<128x4xbf16, #tpu.memory_space<vmem>>, %arg3: memref<36x128xbf16, #tpu.memory_space<vmem>>, %arg4: memref<4x128xbf16, #tpu.memory_space<vmem>>, %arg5: memref<128x128xbf16, #tpu.memory_space<vmem>>, %arg6: memref<1x2x128xf32, #tpu.memory_space<vmem>>, %arg7: memref<1x2x128xf32, #tpu.memory_space<vmem>>) attributes {dimension_semantics = [#tpu.dimension_semantics<parallel>], iteration_bounds = array<i64: 1>, scalar_prefetch = 0 : i64, scratch_operands = 0 : i64, tpu.core_type = #tpu.core_type<tc>, window_params = [{transform_indices = @transform_0, window_bounds = array<i64: 128, 36>}, {transform_indices = @transform_1, window_bounds = array<i64: 128, 4>}, {pipeline_mode = #tpu.pipeline_mode<synchronous>, transform_indices = @transform_2, window_bounds = array<i64: 36, 128>}, {pipeline_mode = #tpu.pipeline_mode<synchronous>, transform_indices = @transform_3, window_bounds = array<i64: 4, 128>}, {transform_indices = @transform_4, window_bounds = array<i64: 128, 128>}, {transform_indices = @transform_5, window_bounds = array<i64: 1, 2, 128>}, {transform_indices = @transform_6, window_bounds = array<i64: 1, 2, 128>}]} {
    %c0 = arith.constant 0 : index
    %c0_0 = arith.constant 0 : index
    %0 = vector.load %arg1[%c0, %c0_0] : memref<128x36xbf16, #tpu.memory_space<vmem>>, vector<128x36xbf16>
    %c0_1 = arith.constant 0 : index
    %c0_2 = arith.constant 0 : index
    %1 = vector.load %arg3[%c0_1, %c0_2] : memref<36x128xbf16, #tpu.memory_space<vmem>>, vector<36x128xbf16>
    %cst = arith.constant dense<0.000000e+00> : vector<128x128xf32>
    %2 = tpu.matmul %0, %1, %cst {dimension_numbers = #tpu.dot_dimension_numbers<[1], [0], [0], [1], [0, 0, 1, 1], [], []>} : vector<128x36xbf16>, vector<36x128xbf16>, vector<128x128xf32> -> vector<128x128xf32>
    %3 = arith.truncf %2 : vector<128x128xf32> to vector<128x128xbf16>
    %c0_3 = arith.constant 0 : index
    %c0_4 = arith.constant 0 : index
    %4 = vector.load %arg5[%c0_3, %c0_4] : memref<128x128xbf16, #tpu.memory_space<vmem>>, vector<128x128xbf16>
    tpu.vector_store %arg5[%c0_3, %c0_4], %3 {strides = array<i32>} : memref<128x128xbf16, #tpu.memory_space<vmem>>, vector<128x128xbf16>,
    %cst_5 = arith.constant dense<0.000000e+00> : vector<128xf32>
    %5 = vector.multi_reduction <add>, %2, %cst_5 [0] : vector<128x128xf32> to vector<128xf32>
    %6 = vector.shape_cast %5 : vector<128xf32> to vector<1x128xf32>
    %c0_6 = arith.constant 0 : index
    %c0_7 = arith.constant 0 : index
    %c0_8 = arith.constant 0 : index
    %7 = vector.load %arg6[%c0_6, %c0_7, %c0_8] : memref<1x2x128xf32, #tpu.memory_space<vmem>>, vector<1x1x128xf32>
    %8 = vector.shape_cast %7 : vector<1x1x128xf32> to vector<1x128xf32>
    %9 = vector.shape_cast %6 : vector<1x128xf32> to vector<1x1x128xf32>
    tpu.vector_store %arg6[%c0_6, %c0_7, %c0_8], %9 {strides = array<i32>} : memref<1x2x128xf32, #tpu.memory_space<vmem>>, vector<1x1x128xf32>,
    %10 = arith.mulf %2, %2 : vector<128x128xf32>
    %cst_9 = arith.constant dense<0.000000e+00> : vector<128xf32>
    %11 = vector.multi_reduction <add>, %10, %cst_9 [0] : vector<128x128xf32> to vector<128xf32>
    %12 = vector.shape_cast %11 : vector<128xf32> to vector<1x128xf32>
    %c0_10 = arith.constant 0 : index
    %c1 = arith.constant 1 : index
    %c0_11 = arith.constant 0 : index
    %13 = vector.load %arg6[%c0_10, %c1, %c0_11] : memref<1x2x128xf32, #tpu.memory_space<vmem>>, vector<1x1x128xf32>
    %14 = vector.shape_cast %13 : vector<1x1x128xf32> to vector<1x128xf32>
    %15 = vector.shape_cast %12 : vector<1x128xf32> to vector<1x1x128xf32>
    tpu.vector_store %arg6[%c0_10, %c1, %c0_11], %15 {strides = array<i32>} : memref<1x2x128xf32, #tpu.memory_space<vmem>>, vector<1x1x128xf32>,
    %c0_12 = arith.constant 0 : index
    %c0_13 = arith.constant 0 : index
    %16 = vector.load %arg2[%c0_12, %c0_13] : memref<128x4xbf16, #tpu.memory_space<vmem>>, vector<128x4xbf16>
    %c0_14 = arith.constant 0 : index
    %c0_15 = arith.constant 0 : index
    %17 = vector.load %arg4[%c0_14, %c0_15] : memref<4x128xbf16, #tpu.memory_space<vmem>>, vector<4x128xbf16>
    %cst_16 = arith.constant dense<0.000000e+00> : vector<128x128xf32>
    %18 = tpu.matmul %16, %17, %cst_16 {dimension_numbers = #tpu.dot_dimension_numbers<[1], [0], [0], [1], [0, 0, 1, 1], [], []>} : vector<128x4xbf16>, vector<4x128xbf16>, vector<128x128xf32> -> vector<128x128xf32>
    %cst_17 = arith.constant dense<0.000000e+00> : vector<128xf32>
    %19 = vector.multi_reduction <add>, %18, %cst_17 [0] : vector<128x128xf32> to vector<128xf32>
    %20 = vector.shape_cast %19 : vector<128xf32> to vector<1x128xf32>
    %c0_18 = arith.constant 0 : index
    %c0_19 = arith.constant 0 : index
    %c0_20 = arith.constant 0 : index
    %21 = vector.load %arg7[%c0_18, %c0_19, %c0_20] : memref<1x2x128xf32, #tpu.memory_space<vmem>>, vector<1x1x128xf32>
    %22 = vector.shape_cast %21 : vector<1x1x128xf32> to vector<1x128xf32>
    %23 = vector.shape_cast %20 : vector<1x128xf32> to vector<1x1x128xf32>
    tpu.vector_store %arg7[%c0_18, %c0_19, %c0_20], %23 {strides = array<i32>} : memref<1x2x128xf32, #tpu.memory_space<vmem>>, vector<1x1x128xf32>,
    %24 = arith.mulf %18, %18 : vector<128x128xf32>
    %cst_21 = arith.constant dense<0.000000e+00> : vector<128xf32>
    %25 = vector.multi_reduction <add>, %24, %cst_21 [0] : vector<128x128xf32> to vector<128xf32>
    %26 = vector.shape_cast %25 : vector<128xf32> to vector<1x128xf32>
    %c0_22 = arith.constant 0 : index
    %c1_23 = arith.constant 1 : index
    %c0_24 = arith.constant 0 : index
    %27 = vector.load %arg7[%c0_22, %c1_23, %c0_24] : memref<1x2x128xf32, #tpu.memory_space<vmem>>, vector<1x1x128xf32>
    %28 = vector.shape_cast %27 : vector<1x1x128xf32> to vector<1x128xf32>
    %29 = vector.shape_cast %26 : vector<1x128xf32> to vector<1x1x128xf32>
    tpu.vector_store %arg7[%c0_22, %c1_23, %c0_24], %29 {strides = array<i32>} : memref<1x2x128xf32, #tpu.memory_space<vmem>>, vector<1x1x128xf32>,
    return
  }
  func.func @transform_0(%arg0: i32) -> (i32, i32) {
    %c0_i32 = arith.constant 0 : i32
    %c0_i32_0 = arith.constant 0 : i32
    return %arg0, %c0_i32 : i32, i32
  }
  func.func @transform_1(%arg0: i32) -> (i32, i32) {
    %c0_i32 = arith.constant 0 : i32
    %c0_i32_0 = arith.constant 0 : i32
    return %arg0, %c0_i32 : i32, i32
  }
  func.func @transform_2(%arg0: i32) -> (i32, i32) {
    %c0_i32 = arith.constant 0 : i32
    %c0_i32_0 = arith.constant 0 : i32
    %c0_i32_1 = arith.constant 0 : i32
    return %c0_i32, %c0_i32_0 : i32, i32
  }
  func.func @transform_3(%arg0: i32) -> (i32, i32) {
    %c0_i32 = arith.constant 0 : i32
    %c0_i32_0 = arith.constant 0 : i32
    %c0_i32_1 = arith.constant 0 : i32
    return %c0_i32, %c0_i32_0 : i32, i32
  }
  func.func @transform_4(%arg0: i32) -> (i32, i32) {
    %c0_i32 = arith.constant 0 : i32
    %c0_i32_0 = arith.constant 0 : i32
    return %arg0, %c0_i32 : i32, i32
  }
  func.func @transform_5(%arg0: i32) -> (i32, i32, i32) {
    %c0_i32 = arith.constant 0 : i32
    %c0_i32_0 = arith.constant 0 : i32
    %c0_i32_1 = arith.constant 0 : i32
    return %arg0, %c0_i32, %c0_i32_0 : i32, i32, i32
  }
  func.func @transform_6(%arg0: i32) -> (i32, i32, i32) {
    %c0_i32 = arith.constant 0 : i32
    %c0_i32_0 = arith.constant 0 : i32
    %c0_i32_1 = arith.constant 0 : i32
    return %arg0, %c0_i32, %c0_i32_0 : i32, i32, i32
  }
}

module attributes {stable_mosaic.version = 11 : i64} {
  func.func @_bn_relu_kernel(%arg0: i32, %arg1: memref<128x128xbf16, #tpu.memory_space<vmem>>, %arg2: memref<2x128xf32, #tpu.memory_space<vmem>>, %arg3: memref<128x128xbf16, #tpu.memory_space<vmem>>) attributes {dimension_semantics = [#tpu.dimension_semantics<parallel>], iteration_bounds = array<i64: 1>, scalar_prefetch = 0 : i64, scratch_operands = 0 : i64, tpu.core_type = #tpu.core_type<tc>, window_params = [{transform_indices = @transform_0, window_bounds = array<i64: 128, 128>}, {pipeline_mode = #tpu.pipeline_mode<synchronous>, transform_indices = @transform_1, window_bounds = array<i64: 2, 128>}, {transform_indices = @transform_2, window_bounds = array<i64: 128, 128>}]} {
    %c0 = arith.constant 0 : index
    %c0_0 = arith.constant 0 : index
    %0 = vector.load %arg1[%c0, %c0_0] : memref<128x128xbf16, #tpu.memory_space<vmem>>, vector<128x128xbf16>
    %1 = arith.extf %0 : vector<128x128xbf16> to vector<128x128xf32>
    %c0_1 = arith.constant 0 : index
    %c0_2 = arith.constant 0 : index
    %2 = vector.load %arg2[%c0_1, %c0_2] : memref<2x128xf32, #tpu.memory_space<vmem>>, vector<1x128xf32>
    %3 = vector.broadcast %2 : vector<1x128xf32> to vector<128x128xf32>
    %4 = arith.mulf %1, %3 : vector<128x128xf32>
    %c1 = arith.constant 1 : index
    %c0_3 = arith.constant 0 : index
    %5 = vector.load %arg2[%c1, %c0_3] : memref<2x128xf32, #tpu.memory_space<vmem>>, vector<1x128xf32>
    %6 = vector.broadcast %5 : vector<1x128xf32> to vector<128x128xf32>
    %7 = arith.addf %4, %6 : vector<128x128xf32>
    %cst = arith.constant 0.000000e+00 : f32
    %8 = vector.broadcast %cst : f32 to vector<128x128xf32>
    %9 = arith.maximumf %7, %8 : vector<128x128xf32>
    %10 = arith.truncf %9 : vector<128x128xf32> to vector<128x128xbf16>
    %c0_4 = arith.constant 0 : index
    %c0_5 = arith.constant 0 : index
    %11 = vector.load %arg3[%c0_4, %c0_5] : memref<128x128xbf16, #tpu.memory_space<vmem>>, vector<128x128xbf16>
    tpu.vector_store %arg3[%c0_4, %c0_5], %10 {strides = array<i32>} : memref<128x128xbf16, #tpu.memory_space<vmem>>, vector<128x128xbf16>,
    return
  }
  func.func @transform_0(%arg0: i32) -> (i32, i32) {
    %c0_i32 = arith.constant 0 : i32
    %c0_i32_0 = arith.constant 0 : i32
    return %arg0, %c0_i32 : i32, i32
  }
  func.func @transform_1(%arg0: i32) -> (i32, i32) {
    %c0_i32 = arith.constant 0 : i32
    %c0_i32_0 = arith.constant 0 : i32
    %c0_i32_1 = arith.constant 0 : i32
    return %c0_i32, %c0_i32_0 : i32, i32
  }
  func.func @transform_2(%arg0: i32) -> (i32, i32) {
    %c0_i32 = arith.constant 0 : i32
    %c0_i32_0 = arith.constant 0 : i32
    return %arg0, %c0_i32 : i32, i32
  }
}

module attributes {stable_mosaic.version = 11 : i64} {
  func.func @_gemm_stats_kernel(%arg0: i32, %arg1: memref<128x1152xbf16, #tpu.memory_space<vmem>>, %arg2: memref<1152x128xbf16, #tpu.memory_space<vmem>>, %arg3: memref<128x128xbf16, #tpu.memory_space<vmem>>, %arg4: memref<1x2x128xf32, #tpu.memory_space<vmem>>) attributes {dimension_semantics = [#tpu.dimension_semantics<parallel>], iteration_bounds = array<i64: 1>, scalar_prefetch = 0 : i64, scratch_operands = 0 : i64, tpu.core_type = #tpu.core_type<tc>, window_params = [{transform_indices = @transform_0, window_bounds = array<i64: 128, 1152>}, {pipeline_mode = #tpu.pipeline_mode<synchronous>, transform_indices = @transform_1, window_bounds = array<i64: 1152, 128>}, {transform_indices = @transform_2, window_bounds = array<i64: 128, 128>}, {transform_indices = @transform_3, window_bounds = array<i64: 1, 2, 128>}]} {
    %c0 = arith.constant 0 : index
    %c0_0 = arith.constant 0 : index
    %0 = vector.load %arg1[%c0, %c0_0] : memref<128x1152xbf16, #tpu.memory_space<vmem>>, vector<128x1152xbf16>
    %c0_1 = arith.constant 0 : index
    %c0_2 = arith.constant 0 : index
    %1 = vector.load %arg2[%c0_1, %c0_2] : memref<1152x128xbf16, #tpu.memory_space<vmem>>, vector<1152x128xbf16>
    %cst = arith.constant dense<0.000000e+00> : vector<128x128xf32>
    %2 = tpu.matmul %0, %1, %cst {dimension_numbers = #tpu.dot_dimension_numbers<[1], [0], [0], [1], [0, 0, 1, 1], [], []>} : vector<128x1152xbf16>, vector<1152x128xbf16>, vector<128x128xf32> -> vector<128x128xf32>
    %3 = arith.truncf %2 : vector<128x128xf32> to vector<128x128xbf16>
    %c0_3 = arith.constant 0 : index
    %c0_4 = arith.constant 0 : index
    %4 = vector.load %arg3[%c0_3, %c0_4] : memref<128x128xbf16, #tpu.memory_space<vmem>>, vector<128x128xbf16>
    tpu.vector_store %arg3[%c0_3, %c0_4], %3 {strides = array<i32>} : memref<128x128xbf16, #tpu.memory_space<vmem>>, vector<128x128xbf16>,
    %cst_5 = arith.constant dense<0.000000e+00> : vector<128xf32>
    %5 = vector.multi_reduction <add>, %2, %cst_5 [0] : vector<128x128xf32> to vector<128xf32>
    %6 = vector.shape_cast %5 : vector<128xf32> to vector<1x128xf32>
    %c0_6 = arith.constant 0 : index
    %c0_7 = arith.constant 0 : index
    %c0_8 = arith.constant 0 : index
    %7 = vector.load %arg4[%c0_6, %c0_7, %c0_8] : memref<1x2x128xf32, #tpu.memory_space<vmem>>, vector<1x1x128xf32>
    %8 = vector.shape_cast %7 : vector<1x1x128xf32> to vector<1x128xf32>
    %9 = vector.shape_cast %6 : vector<1x128xf32> to vector<1x1x128xf32>
    tpu.vector_store %arg4[%c0_6, %c0_7, %c0_8], %9 {strides = array<i32>} : memref<1x2x128xf32, #tpu.memory_space<vmem>>, vector<1x1x128xf32>,
    %10 = arith.mulf %2, %2 : vector<128x128xf32>
    %cst_9 = arith.constant dense<0.000000e+00> : vector<128xf32>
    %11 = vector.multi_reduction <add>, %10, %cst_9 [0] : vector<128x128xf32> to vector<128xf32>
    %12 = vector.shape_cast %11 : vector<128xf32> to vector<1x128xf32>
    %c0_10 = arith.constant 0 : index
    %c1 = arith.constant 1 : index
    %c0_11 = arith.constant 0 : index
    %13 = vector.load %arg4[%c0_10, %c1, %c0_11] : memref<1x2x128xf32, #tpu.memory_space<vmem>>, vector<1x1x128xf32>
    %14 = vector.shape_cast %13 : vector<1x1x128xf32> to vector<1x128xf32>
    %15 = vector.shape_cast %12 : vector<1x128xf32> to vector<1x1x128xf32>
    tpu.vector_store %arg4[%c0_10, %c1, %c0_11], %15 {strides = array<i32>} : memref<1x2x128xf32, #tpu.memory_space<vmem>>, vector<1x1x128xf32>,
    return
  }
  func.func @transform_0(%arg0: i32) -> (i32, i32) {
    %c0_i32 = arith.constant 0 : i32
    %c0_i32_0 = arith.constant 0 : i32
    return %arg0, %c0_i32 : i32, i32
  }
  func.func @transform_1(%arg0: i32) -> (i32, i32) {
    %c0_i32 = arith.constant 0 : i32
    %c0_i32_0 = arith.constant 0 : i32
    %c0_i32_1 = arith.constant 0 : i32
    return %c0_i32, %c0_i32_0 : i32, i32
  }
  func.func @transform_2(%arg0: i32) -> (i32, i32) {
    %c0_i32 = arith.constant 0 : i32
    %c0_i32_0 = arith.constant 0 : i32
    return %arg0, %c0_i32 : i32, i32
  }
  func.func @transform_3(%arg0: i32) -> (i32, i32, i32) {
    %c0_i32 = arith.constant 0 : i32
    %c0_i32_0 = arith.constant 0 : i32
    %c0_i32_1 = arith.constant 0 : i32
    return %arg0, %c0_i32, %c0_i32_0 : i32, i32, i32
  }
}

module attributes {stable_mosaic.version = 11 : i64} {
  func.func @_final_proj_kernel(%arg0: i32, %arg1: memref<128x128xbf16, #tpu.memory_space<vmem>>, %arg2: memref<128x4xbf16, #tpu.memory_space<vmem>>, %arg3: memref<4x128xbf16, #tpu.memory_space<vmem>>, %arg4: memref<2x128xf32, #tpu.memory_space<vmem>>, %arg5: memref<2x128xf32, #tpu.memory_space<vmem>>, %arg6: memref<128x128xf32, #tpu.memory_space<vmem>>) attributes {dimension_semantics = [#tpu.dimension_semantics<parallel>], iteration_bounds = array<i64: 1>, scalar_prefetch = 0 : i64, scratch_operands = 0 : i64, tpu.core_type = #tpu.core_type<tc>, window_params = [{transform_indices = @transform_0, window_bounds = array<i64: 128, 128>}, {transform_indices = @transform_1, window_bounds = array<i64: 128, 4>}, {pipeline_mode = #tpu.pipeline_mode<synchronous>, transform_indices = @transform_2, window_bounds = array<i64: 4, 128>}, {pipeline_mode = #tpu.pipeline_mode<synchronous>, transform_indices = @transform_3, window_bounds = array<i64: 2, 128>}, {pipeline_mode = #tpu.pipeline_mode<synchronous>, transform_indices = @transform_4, window_bounds = array<i64: 2, 128>}, {transform_indices = @transform_5, window_bounds = array<i64: 128, 128>}]} {
    %c0 = arith.constant 0 : index
    %c0_0 = arith.constant 0 : index
    %0 = vector.load %arg1[%c0, %c0_0] : memref<128x128xbf16, #tpu.memory_space<vmem>>, vector<128x128xbf16>
    %1 = arith.extf %0 : vector<128x128xbf16> to vector<128x128xf32>
    %c0_1 = arith.constant 0 : index
    %c0_2 = arith.constant 0 : index
    %2 = vector.load %arg2[%c0_1, %c0_2] : memref<128x4xbf16, #tpu.memory_space<vmem>>, vector<128x4xbf16>
    %c0_3 = arith.constant 0 : index
    %c0_4 = arith.constant 0 : index
    %3 = vector.load %arg3[%c0_3, %c0_4] : memref<4x128xbf16, #tpu.memory_space<vmem>>, vector<4x128xbf16>
    %cst = arith.constant dense<0.000000e+00> : vector<128x128xf32>
    %4 = tpu.matmul %2, %3, %cst {dimension_numbers = #tpu.dot_dimension_numbers<[1], [0], [0], [1], [0, 0, 1, 1], [], []>} : vector<128x4xbf16>, vector<4x128xbf16>, vector<128x128xf32> -> vector<128x128xf32>
    %c0_5 = arith.constant 0 : index
    %c0_6 = arith.constant 0 : index
    %5 = vector.load %arg4[%c0_5, %c0_6] : memref<2x128xf32, #tpu.memory_space<vmem>>, vector<1x128xf32>
    %6 = vector.broadcast %5 : vector<1x128xf32> to vector<128x128xf32>
    %7 = arith.mulf %1, %6 : vector<128x128xf32>
    %c1 = arith.constant 1 : index
    %c0_7 = arith.constant 0 : index
    %8 = vector.load %arg4[%c1, %c0_7] : memref<2x128xf32, #tpu.memory_space<vmem>>, vector<1x128xf32>
    %9 = vector.broadcast %8 : vector<1x128xf32> to vector<128x128xf32>
    %10 = arith.addf %7, %9 : vector<128x128xf32>
    %c0_8 = arith.constant 0 : index
    %c0_9 = arith.constant 0 : index
    %11 = vector.load %arg5[%c0_8, %c0_9] : memref<2x128xf32, #tpu.memory_space<vmem>>, vector<1x128xf32>
    %12 = vector.broadcast %11 : vector<1x128xf32> to vector<128x128xf32>
    %13 = arith.mulf %4, %12 : vector<128x128xf32>
    %14 = arith.addf %10, %13 : vector<128x128xf32>
    %c1_10 = arith.constant 1 : index
    %c0_11 = arith.constant 0 : index
    %15 = vector.load %arg5[%c1_10, %c0_11] : memref<2x128xf32, #tpu.memory_space<vmem>>, vector<1x128xf32>
    %16 = vector.broadcast %15 : vector<1x128xf32> to vector<128x128xf32>
    %17 = arith.addf %14, %16 : vector<128x128xf32>
    %cst_12 = arith.constant 0.000000e+00 : f32
    %18 = vector.broadcast %cst_12 : f32 to vector<128x128xf32>
    %19 = arith.maximumf %17, %18 : vector<128x128xf32>
    %c0_13 = arith.constant 0 : index
    %c0_14 = arith.constant 0 : index
    %20 = vector.load %arg6[%c0_13, %c0_14] : memref<128x128xf32, #tpu.memory_space<vmem>>, vector<128x128xf32>
    tpu.vector_store %arg6[%c0_13, %c0_14], %19 {strides = array<i32>} : memref<128x128xf32, #tpu.memory_space<vmem>>, vector<128x128xf32>,
    return
  }
  func.func @transform_0(%arg0: i32) -> (i32, i32) {
    %c0_i32 = arith.constant 0 : i32
    %c0_i32_0 = arith.constant 0 : i32
    return %arg0, %c0_i32 : i32, i32
  }
  func.func @transform_1(%arg0: i32) -> (i32, i32) {
    %c0_i32 = arith.constant 0 : i32
    %c0_i32_0 = arith.constant 0 : i32
    return %arg0, %c0_i32 : i32, i32
  }
  func.func @transform_2(%arg0: i32) -> (i32, i32) {
    %c0_i32 = arith.constant 0 : i32
    %c0_i32_0 = arith.constant 0 : i32
    %c0_i32_1 = arith.constant 0 : i32
    return %c0_i32, %c0_i32_0 : i32, i32
  }
  func.func @transform_3(%arg0: i32) -> (i32, i32) {
    %c0_i32 = arith.constant 0 : i32
    %c0_i32_0 = arith.constant 0 : i32
    %c0_i32_1 = arith.constant 0 : i32
    return %c0_i32, %c0_i32_0 : i32, i32
  }
  func.func @transform_4(%arg0: i32) -> (i32, i32) {
    %c0_i32 = arith.constant 0 : i32
    %c0_i32_0 = arith.constant 0 : i32
    %c0_i32_1 = arith.constant 0 : i32
    return %c0_i32, %c0_i32_0 : i32, i32
  }
  func.func @transform_5(%arg0: i32) -> (i32, i32) {
    %c0_i32 = arith.constant 0 : i32
    %c0_i32_0 = arith.constant 0 : i32
    return %arg0, %c0_i32 : i32, i32
  }
}

</mosaic_0001>

<bundles_post_ra>
// kernel: residual_block.5
= control target key start
LH: loop header
LB: loop body
LE: loop exit
PB: predicated region body
PF: predicated region fallthrough
CT: control target
= control target key end

     0   :  { %s324_s0 = inlined_call_operand.vmem [shape: bf16[128,128], index: 0, kind: input, shape index: {}]   ;;  %s325_s1 = inlined_call_operand.vmem [shape: f32[2,128], index: 1, kind: input, shape index: {}]   ;;  %s326_s2 = inlined_call_operand.vmem [shape: bf16[128,128], index: 2, kind: output, shape index: {}]  }
   0x1   :  { %v132_v0 = vld [vmem:[%s324_s0] sm:$0xff]   ;;  %v203_v5 = vld [vmem:[%s324_s0 + $0x8] sm:$0xff]   ;;  %v204_v8 = vld [vmem:[%s324_s0 + $0x10] sm:$0xff]  }
   0x2   :  { %v240_v1 = vld [vmem:[%s325_s1] ss:$0 sm:$0xff]  ;;  %v133_v2 = vunpack.c.l.bf16 %v132_v0  ;;  %v134_v3 = vunpack.c.h.bf16 %v132_v0  ;;  %v245_v4 = vld [vmem:[%s325_s1 + $0x1] ss:$0 sm:$0xff]  ;;  %v137_v6 = vunpack.c.l.bf16 %v203_v5  ;;  %v138_v7 = vunpack.c.h.bf16 %v203_v5  ;;  %v205_v9 = vld [vmem:[%s324_s0 + $0x18] sm:$0xff]  }
   0x3   :  { %v141_v12 = vunpack.c.l.bf16 %v204_v8  ;;  %v142_v13 = vunpack.c.h.bf16 %v204_v8  ;;  %v145_v16 = vunpack.c.l.bf16 %v205_v9  ;;  %v146_v17 = vunpack.c.h.bf16 %v205_v9  ;;  %v206_v26 = vld [vmem:[%s324_s0 + $0x20] sm:$0xff]   ;;  %v207_v35 = vld [vmem:[%s324_s0 + $0x28] sm:$0xff]   ;;  %v208_v40 = vld [vmem:[%s324_s0 + $0x30] sm:$0xff]  }
   0x4   :  { %v45_v10 = vmul.f32 %v240_v1, %v133_v2  ;;  %v46_v11 = vmul.f32 %v240_v1, %v134_v3  ;;  %v47_v14 = vmul.f32 %v240_v1, %v137_v6  ;;  %v48_v15 = vmul.f32 %v240_v1, %v138_v7  ;;  %v209_v45 = vld [vmem:[%s324_s0 + $0x38] sm:$0xff]  }
   0x5   :  { %v49_v20 = vmul.f32 %v240_v1, %v141_v12  ;;  %v50_v21 = vmul.f32 %v240_v1, %v142_v13  ;;  %v51_v24 = vmul.f32 %v240_v1, %v145_v16  ;;  %v52_v25 = vmul.f32 %v240_v1, %v146_v17 }
   0x6   :  { %v63_v18 = vadd.f32 %v245_v4, %v45_v10  ;;  %v64_v19 = vadd.f32 %v245_v4, %v46_v11  ;;  %v65_v22 = vadd.f32 %v245_v4, %v47_v14  ;;  %v66_v23 = vadd.f32 %v245_v4, %v48_v15 }
   0x7   :  { %v67_v29 = vadd.f32 %v245_v4, %v49_v20  ;;  %v68_v30 = vadd.f32 %v245_v4, %v50_v21  ;;  %v69_v33 = vadd.f32 %v245_v4, %v51_v24  ;;  %v70_v34 = vadd.f32 %v245_v4, %v52_v25 }
   0x8   :  { %v79_v27 = vmax.f32 %v63_v18, 0.0  ;;  %v80_v28 = vmax.f32 %v64_v19, 0.0  ;;  %v81_v31 = vmax.f32 %v65_v22, 0.0  ;;  %v82_v32 = vmax.f32 %v66_v23, 0.0 }
   0x9   :  { %v83_v37 = vmax.f32 %v67_v29, 0.0  ;;  %v84_v38 = vmax.f32 %v68_v30, 0.0  ;;  %v149_v39 = vunpack.c.l.bf16 %v206_v26  ;;  %v85_v42 = vmax.f32 %v69_v33, 0.0 }
   0xa   :  { %v166_v36 = vpack.c.bf16 %v80_v28, %v79_v27  ;;  %v171_v41 = vpack.c.bf16 %v82_v32, %v81_v31  ;;  %v86_v43 = vmax.f32 %v70_v34, 0.0  ;;  %v150_v44 = vunpack.c.h.bf16 %v206_v26 }
   0xb   :  { %v176_v46 = vpack.c.bf16 %v84_v38, %v83_v37  ;;  %v53_v47 = vmul.f32 %v240_v1, %v149_v39  ;;  %v153_v48 = vunpack.c.l.bf16 %v207_v35  ;;  %v154_v49 = vunpack.c.h.bf16 %v207_v35 }
   0xc   :  { %167 = vst [vmem:[%s326_s2] sm:$0xff] %v166_v36   ;;  %v181_v50 = vpack.c.bf16 %v86_v43, %v85_v42  ;;  %v54_v51 = vmul.f32 %v240_v1, %v150_v44  ;;  %v157_v52 = vunpack.c.l.bf16 %v208_v40  ;;  %v158_v53 = vunpack.c.h.bf16 %v208_v40 }
   0xd   :  { %210 = vst [vmem:[%s326_s2 + $0x8] sm:$0xff] %v171_v41   ;;  %v71_v54 = vadd.f32 %v245_v4, %v53_v47  ;;  %v55_v55 = vmul.f32 %v240_v1, %v153_v48  ;;  %v56_v56 = vmul.f32 %v240_v1, %v154_v49  ;;  %v161_v57 = vunpack.c.l.bf16 %v209_v45 }
   0xe   :  { %211 = vst [vmem:[%s326_s2 + $0x10] sm:$0xff] %v176_v46   ;;  %v72_v58 = vadd.f32 %v245_v4, %v54_v51  ;;  %v57_v59 = vmul.f32 %v240_v1, %v157_v52  ;;  %v58_v60 = vmul.f32 %v240_v1, %v158_v53  ;;  %v162_v61 = vunpack.c.h.bf16 %v209_v45 }
   0xf   :  { %212 = vst [vmem:[%s326_s2 + $0x18] sm:$0xff] %v181_v50   ;;  %v87_v62 = vmax.f32 %v71_v54, 0.0  ;;  %v73_v63 = vadd.f32 %v245_v4, %v55_v55  ;;  %v74_v0 = vadd.f32 %v245_v4, %v56_v56  ;;  %v59_v2 = vmul.f32 %v240_v1, %v161_v57 }
  0x10   :  { %v88_v3 = vmax.f32 %v72_v58, 0.0  ;;  %v75_v5 = vadd.f32 %v245_v4, %v57_v59  ;;  %v76_v6 = vadd.f32 %v245_v4, %v58_v60  ;;  %v60_v7 = vmul.f32 %v240_v1, %v162_v61 }
  0x11   :  { %v89_v8 = vmax.f32 %v73_v63, 0.0  ;;  %v90_v9 = vmax.f32 %v74_v0, 0.0  ;;  %v77_v10 = vadd.f32 %v245_v4, %v59_v2 }
  0x12   :  { %v186_v11 = vpack.c.bf16 %v88_v3, %v87_v62  ;;  %v91_v12 = vmax.f32 %v75_v5, 0.0  ;;  %v92_v13 = vmax.f32 %v76_v6, 0.0  ;;  %v78_v14 = vadd.f32 %v245_v4, %v60_v7 }
  0x13   :  { %v191_v15 = vpack.c.bf16 %v90_v9, %v89_v8  ;;  %v93_v16 = vmax.f32 %v77_v10, 0.0 }
  0x14   :  { %213 = vst [vmem:[%s326_s2 + $0x20] sm:$0xff] %v186_v11   ;;  %v196_v17 = vpack.c.bf16 %v92_v13, %v91_v12  ;;  %v94_v18 = vmax.f32 %v78_v14, 0.0 }
  0x15   :  { %214 = vst [vmem:[%s326_s2 + $0x28] sm:$0xff] %v191_v15  }
  0x16   :  { %215 = vst [vmem:[%s326_s2 + $0x30] sm:$0xff] %v196_v17   ;;  %v201_v1 = vpack.c.bf16 %v94_v18, %v93_v16 }
  0x18   :  { %216 = vst [vmem:[%s326_s2 + $0x38] sm:$0xff] %v201_v1  }

// kernel: residual_block.4
= control target key start
LH: loop header
LB: loop body
LE: loop exit
PB: predicated region body
PF: predicated region fallthrough
CT: control target
= control target key end

     0   :  { %vm122_vm0 = vcmask 1041408   ;;  %vm324_vm1 = vcmask 31744   ;;  %vm97_vm2 = vcmask 293888   ;;  %s833_s3 = inlined_call_operand.vmem [shape: bf16[4,128], index: 3, kind: input, shape index: {}]   ;;  %s834_s1 = inlined_call_operand.vmem [shape: bf16[128,4], index: 1, kind: input, shape index: {}]   ;;  %s835_s2 = inlined_call_operand.vmem [shape: bf16[36,128], index: 2, kind: input, shape index: {}]   ;;  %s836_s0 = inlined_call_operand.vmem [shape: bf16[128,36], index: 0, kind: input, shape index: {}]   ;;  %s837_s4 = inlined_call_operand.vmem [shape: bf16[128,128], index: 4, kind: output, shape index: {0}]   ;;  %s838_s5 = inlined_call_operand.vmem [shape: f32[1,2,128], index: 5, kind: output, shape index: {1}]   ;;  %s839_s6 = inlined_call_operand.vmem [shape: f32[1,2,128], index: 6, kind: output, shape index: {2}]  }
   0x1   :  { %v283_v0 = vld [vmem:[%s833_s3] sm:$0x3]  ;;  %v41_v1 = vld [vmem:[%s835_s2 + $0x10] sm:$0x3]  ;;  %v576_v6 = vld [vmem:[%s834_s1 + $0x28] sm:$0xff] }
   0x2   :  { %v350_v2 = vsel %vm122_vm0, %v283_v0, 0  ;;  %v571_v3 = vld [vmem:[%s834_s1] sm:$0xff]  ;;  %v91_v4 = vunpack.c.l.b16 %v41_v1  ;;  %v570_v8 = vld [vmem:[%s835_s2 + $0x8] sm:$0xff]  ;;  %v577_v13 = vld [vmem:[%s834_s1 + $0x30] sm:$0xff] }
   0x3   :  { %359 = vmatpush.bf16.msra.mxu1 %v350_v2  ;;  %629 = vmatpush.bf16.msra.mxu3 %v350_v2  ;;  %v569_v9 = vld [vmem:[%s835_s2] sm:$0xff]  ;;  %v572_v12 = vld [vmem:[%s834_s1 + $0x8] sm:$0xff]  ;;  %v573_v16 = vld [vmem:[%s834_s1 + $0x10] sm:$0xff] }
   0x4   :  { %v94_v5 = vpack.c.b16 %v91_v4, %v91_v4  ;;  %v561_v10 = vld [vmem:[%s836_s0] sm:$0xff]  ;;  %v562_v14 = vld [vmem:[%s836_s0 + $0x8] sm:$0xff]  ;;  %v578_v17 = vld [vmem:[%s834_s1 + $0x38] sm:$0xff] }
   0x5   :  { %v565_v11 = vld [vmem:[%s836_s0 + $0x20] sm:$0xff]  ;;  %v566_v15 = vld [vmem:[%s836_s0 + $0x28] sm:$0xff]  ;;  %v563_v18 = vld [vmem:[%s836_s0 + $0x10] sm:$0xff] }
   0x6   :  { %553 = vmatmul.msk.bf16.vlgmr.msra.gmra.mxu1 %vm324_vm1, %v571_v3  ;;  %v124_v7 = vsel %vm122_vm0, %v94_v5, 0  ;;  %558 = vmatmul.msk.bf16.vlgmr.msra.gmra.mxu3 %vm324_vm1, %v576_v6  ;;  %v567_v19 = vld [vmem:[%s836_s0 + $0x30] sm:$0xff]  ;;  %v574_v20 = vld [vmem:[%s834_s1 + $0x18] sm:$0xff]  ;;  %v575_v23 = vld [vmem:[%s834_s1 + $0x20] sm:$0xff] }
   0x7   :  { %131 = vmatpush.bf16.msra.mxu0 %v124_v7  ;;  %626 = vmatpush.bf16.msra.mxu2 %v124_v7  ;;  %v564_v21 = vld [vmem:[%s836_s0 + $0x18] sm:$0xff] }
   0x8   :  { %v568_v22 = vld [vmem:[%s836_s0 + $0x38] sm:$0xff] }
   0xb   :  { %132 = vmatpush.bf16.msra.mxu0 %v570_v8  ;;  %627 = vmatpush.bf16.msra.mxu2 %v570_v8 }
   0xf   :  { %133 = vmatpush.bf16.msra.mxu0 %v569_v9  ;;  %628 = vmatpush.bf16.msra.mxu2 %v569_v9 }
  0x12   :  { %513 = vmatmul.msk.bf16.vlgmr.msra.gmra.mxu0 %vm97_vm2, %v561_v10  ;;  %517 = vmatmul.msk.bf16.vlgmr.msra.gmra.mxu2 %vm97_vm2, %v565_v11 }
  0x16   :  { %554 = vmatmul.msk.bf16.gmra.mxu1 %vm324_vm1, %v572_v12  ;;  %559 = vmatmul.msk.bf16.gmra.mxu3 %vm324_vm1, %v577_v13 }
  0x22   :  { %514 = vmatmul.msk.bf16.gmra.mxu0 %vm97_vm2, %v562_v14  ;;  %518 = vmatmul.msk.bf16.gmra.mxu2 %vm97_vm2, %v566_v15 }
  0x26   :  { %555 = vmatmul.msk.bf16.gmra.mxu1 %vm324_vm1, %v573_v16  ;;  %560 = vmatmul.msk.bf16.gmra.mxu3 %vm324_vm1, %v578_v17 }
  0x32   :  { %515 = vmatmul.msk.bf16.gmra.mxu0 %vm97_vm2, %v563_v18  ;;  %519 = vmatmul.msk.bf16.gmra.mxu2 %vm97_vm2, %v567_v19 }
  0x36   :  { %556 = vmatmul.msk.bf16.gmra.mxu1 %vm324_vm1, %v574_v20 }
  0x42   :  { %516 = vmatmul.msk.bf16.gmra.mxu0 %vm97_vm2, %v564_v21  ;;  %520 = vmatmul.msk.bf16.gmra.mxu2 %vm97_vm2, %v568_v22 }
  0x46   :  { %557 = vmatmul.msk.bf16.gmra.mxu1 %vm324_vm1, %v575_v23 }
  0x83   :  { %v361_v24 = vpop.f32.mrf.mxu1 }
  0x84   :  { %v423_v52 = vmul.f32 %v361_v24, %v361_v24 }
  0x89   :  { %v753_v35 = vpop.f32.mrf.mxu3 }
  0x8b   :  { %v363_v25 = vpop.f32.mrf.mxu1 }
  0x8c   :  { %v424_v50 = vmul.f32 %v363_v25, %v363_v25  ;;  %v401_v53 = vadd.f32 %v363_v25, %v361_v24 }
  0x8e   :  { %v439_v59 = vadd.f32 %v424_v50, %v423_v52 }
  0x8f   :  { %v135_v26 = vpop.f32.mrf.mxu0 }
  0x90   :  { %v229_v56 = vmul.f32 %v135_v26, %v135_v26 }
  0x91   :  { %v760_v41 = vpop.f32.mrf.mxu3 }
  0x93   :  { %v366_v27 = vpop.f32.mrf.mxu1 }
  0x94   :  { %v425_v54 = vmul.f32 %v366_v27, %v366_v27  ;;  %v402_v60 = vadd.f32 %v401_v53, %v366_v27 }
  0x95   :  { %v741_v28 = vpop.f32.mrf.mxu2 }
  0x96   :  { %v440_v3 = vadd.f32 %v439_v59, %v425_v54 }
  0x97   :  { %v137_v29 = vpop.f32.mrf.mxu0 }
  0x98   :  { %v582_v30 = vpack.c.bf16 %v137_v29, %v135_v26  ;;  %v230_v51 = vmul.f32 %v137_v29, %v137_v29  ;;  %v207_v57 = vadd.f32 %v137_v29, %v135_v26 }
  0x99   :  { %v771_v47 = vpop.f32.mrf.mxu3 }
  0x9a   :  { %583 = vst [vmem:[%s837_s4] sm:$0xff] %v582_v30   ;;  %v245_v63 = vadd.f32 %v230_v51, %v229_v56 }
  0x9b   :  { %v368_v31 = vpop.f32.mrf.mxu1 }
  0x9c   :  { %v426_v61 = vmul.f32 %v368_v31, %v368_v31  ;;  %v403_v4 = vadd.f32 %v402_v60, %v368_v31  ;;  %v433_v60 = vmul.f32 %v753_v35, %v753_v35 }
  0x9d   :  { %v746_v32 = vpop.f32.mrf.mxu2 }
  0x9e   :  { %v602_v33 = vpack.c.bf16 %v746_v32, %v741_v28  ;;  %v441_v11 = vadd.f32 %v440_v3, %v426_v61  ;;  %v238_v52 = vmul.f32 %v746_v32, %v746_v32 }
  0x9f   :  { %v140_v34 = vpop.f32.mrf.mxu0 }
  0xa0   :  { %622 = vst [vmem:[%s837_s4 + $0x20] sm:$0xff] %v602_v33   ;;  %v231_v58 = vmul.f32 %v140_v34, %v140_v34  ;;  %v208_v0 = vadd.f32 %v207_v57, %v140_v34 }
  0xa1   :  { %v783_v10 = vpop.f32.mrf.mxu3 }
  0xa2   :  { %v246_v7 = vadd.f32 %v245_v63, %v231_v58 }
  0xa3   :  { %v371_v36 = vpop.f32.mrf.mxu1 }
  0xa4   :  { %v427_v5 = vmul.f32 %v371_v36, %v371_v36  ;;  %v404_v12 = vadd.f32 %v403_v4, %v371_v36 }
  0xa5   :  { %v755_v37 = vpop.f32.mrf.mxu2 }
  0xa6   :  { %v442_v17 = vadd.f32 %v441_v11, %v427_v5  ;;  %v239_v59 = vmul.f32 %v755_v37, %v755_v37 }
  0xa7   :  { %v142_v38 = vpop.f32.mrf.mxu0 }
  0xa8   :  { %v587_v39 = vpack.c.bf16 %v142_v38, %v140_v34  ;;  %v232_v1 = vmul.f32 %v142_v38, %v142_v38  ;;  %v209_v8 = vadd.f32 %v208_v0, %v142_v38 }
  0xa9   :  { %v396_v51 = vpop.f32.mrf.mxu3 }
  0xaa   :  { %619 = vst [vmem:[%s837_s4 + $0x8] sm:$0xff] %v587_v39   ;;  %v247_v14 = vadd.f32 %v246_v7, %v232_v1 }
  0xab   :  { %v373_v40 = vpop.f32.mrf.mxu1 }
  0xac   :  { %v428_v13 = vmul.f32 %v373_v40, %v373_v40  ;;  %v405_v18 = vadd.f32 %v404_v12, %v373_v40 }
  0xad   :  { %v762_v42 = vpop.f32.mrf.mxu2 }
  0xae   :  { %v607_v43 = vpack.c.bf16 %v762_v42, %v755_v37  ;;  %v443_v24 = vadd.f32 %v442_v17, %v428_v13 }
  0xaf   :  { %v145_v44 = vpop.f32.mrf.mxu0 }
  0xb0   :  { %623 = vst [vmem:[%s837_s4 + $0x28] sm:$0xff] %v607_v43   ;;  %v233_v9 = vmul.f32 %v145_v44, %v145_v44  ;;  %v210_v15 = vadd.f32 %v209_v8, %v145_v44 }
  0xb2   :  { %v248_v21 = vadd.f32 %v247_v14, %v233_v9 }
  0xb3   :  { %v376_v45 = vpop.f32.mrf.mxu1 }
  0xb4   :  { %v429_v19 = vmul.f32 %v376_v45, %v376_v45  ;;  %v406_v25 = vadd.f32 %v405_v18, %v376_v45 }
  0xb5   :  { %v769_v46 = vpop.f32.mrf.mxu2 }
  0xb6   :  { %v444_v31 = vadd.f32 %v443_v24, %v429_v19  ;;  %v437_v19 = vmul.f32 %v396_v51, %v396_v51 }
  0xb7   :  { %v147_v48 = vpop.f32.mrf.mxu0 }
  0xb8   :  { %v592_v49 = vpack.c.bf16 %v147_v48, %v145_v44  ;;  %v234_v16 = vmul.f32 %v147_v48, %v147_v48  ;;  %v211_v22 = vadd.f32 %v210_v15, %v147_v48  ;;  %v398_v15 = vpop.f32.mrf.mxu3 }
  0xba   :  { %620 = vst [vmem:[%s837_s4 + $0x10] sm:$0xff] %v592_v49   ;;  %v249_v29 = vadd.f32 %v248_v21, %v234_v16  ;;  %v237_v49 = vmul.f32 %v741_v28, %v741_v28 }
  0xbb   :  { %v378_v55 = vpop.f32.mrf.mxu1 }
  0xbc   :  { %v430_v26 = vmul.f32 %v378_v55, %v378_v55  ;;  %v407_v33 = vadd.f32 %v406_v25, %v378_v55 }
  0xbd   :  { %v776_v62 = vpop.f32.mrf.mxu2 }
  0xbe   :  { %v612_v2 = vpack.c.bf16 %v776_v62, %v769_v46  ;;  %v445_v40 = vadd.f32 %v444_v31, %v430_v26 }
  0xbf   :  { %v150_v6 = vpop.f32.mrf.mxu0 }
  0xc0   :  { %624 = vst [vmem:[%s837_s4 + $0x30] sm:$0xff] %v612_v2   ;;  %v235_v23 = vmul.f32 %v150_v6, %v150_v6  ;;  %v212_v30 = vadd.f32 %v211_v22, %v150_v6  ;;  %v240_v2 = vmul.f32 %v762_v42, %v762_v42 }
  0xc2   :  { %v250_v38 = vadd.f32 %v249_v29, %v235_v23  ;;  %v438_v23 = vmul.f32 %v398_v15, %v398_v15 }
  0xc3   :  { %v381_v20 = vpop.f32.mrf.mxu1 }
  0xc4   :  { %v431_v34 = vmul.f32 %v381_v20, %v381_v20  ;;  %v408_v48 = vadd.f32 %v407_v33, %v381_v20 }
  0xc5   :  { %v170_v27 = vpop.f32.mrf.mxu2 }
  0xc6   :  { %v446_v53 = vadd.f32 %v445_v40, %v431_v34  ;;  %v243_v18 = vmul.f32 %v170_v27, %v170_v27 }
  0xc7   :  { %v152_v36 = vpop.f32.mrf.mxu0 }
  0xc8   :  { %v597_v39 = vpack.c.bf16 %v152_v36, %v150_v6  ;;  %v213_v43 = vadd.f32 %v212_v30, %v152_v36  ;;  %v236_v44 = vmul.f32 %v152_v36, %v152_v36 }
  0xca   :  { %621 = vst [vmem:[%s837_s4 + $0x18] sm:$0xff] %v597_v39   ;;  %v214_v45 = vadd.f32 %v213_v43, %v741_v28  ;;  %v251_v50 = vadd.f32 %v250_v38, %v236_v44 }
  0xcb   :  { %v383_v54 = vpop.f32.mrf.mxu1 }
  0xcc   :  { %v215_v55 = vadd.f32 %v214_v45, %v746_v32  ;;  %v252_v56 = vadd.f32 %v251_v50, %v237_v49  ;;  %v409_v57 = vadd.f32 %v408_v48, %v383_v54  ;;  %v432_v58 = vmul.f32 %v383_v54, %v383_v54 }
  0xcd   :  { %v172_v61 = vpop.f32.mrf.mxu2  ;;  %v434_v32 = vmul.f32 %v760_v41, %v760_v41 }
  0xce   :  { %v216_v28 = vadd.f32 %v215_v55, %v755_v37  ;;  %v253_v63 = vadd.f32 %v252_v56, %v238_v52  ;;  %v410_v0 = vadd.f32 %v409_v57, %v753_v35  ;;  %v447_v1 = vadd.f32 %v446_v53, %v432_v58 }
  0xcf   :  { %v617_v3 = vpack.c.bf16 %v172_v61, %v170_v27  ;;  %v241_v37 = vmul.f32 %v769_v46, %v769_v46  ;;  %v435_v35 = vmul.f32 %v771_v47, %v771_v47 }
  0xd0   :  { %v254_v4 = vadd.f32 %v253_v63, %v239_v59  ;;  %v217_v5 = vadd.f32 %v216_v28, %v762_v42  ;;  %v411_v6 = vadd.f32 %v410_v0, %v760_v41  ;;  %v448_v7 = vadd.f32 %v447_v1, %v433_v60 }
  0xd1   :  { %625 = vst [vmem:[%s837_s4 + $0x38] sm:$0xff] %v617_v3   ;;  %v242_v41 = vmul.f32 %v776_v62, %v776_v62  ;;  %v436_v42 = vmul.f32 %v783_v10, %v783_v10 }
  0xd2   :  { %v218_v8 = vadd.f32 %v217_v5, %v769_v46  ;;  %v255_v9 = vadd.f32 %v254_v4, %v240_v2  ;;  %v449_v11 = vadd.f32 %v448_v7, %v434_v32  ;;  %v412_v12 = vadd.f32 %v411_v6, %v771_v47 }
  0xd3   :  { %v244_v47 = vmul.f32 %v172_v61, %v172_v61 }
  0xd4   :  { %v219_v13 = vadd.f32 %v218_v8, %v776_v62  ;;  %v256_v14 = vadd.f32 %v255_v9, %v241_v37  ;;  %v413_v16 = vadd.f32 %v412_v12, %v783_v10  ;;  %v450_v17 = vadd.f32 %v449_v11, %v435_v35 }
  0xd6   :  { %v220_v46 = vadd.f32 %v219_v13, %v170_v27  ;;  %v257_v20 = vadd.f32 %v256_v14, %v242_v41  ;;  %v414_v21 = vadd.f32 %v413_v16, %v396_v51  ;;  %v451_v22 = vadd.f32 %v450_v17, %v436_v42 }
  0xd8   :  { %v258_v24 = vadd.f32 %v257_v20, %v243_v18  ;;  %v221_v25 = vadd.f32 %v220_v46, %v172_v61  ;;  %v415_v26 = vadd.f32 %v414_v21, %v398_v15  ;;  %v452_v29 = vadd.f32 %v451_v22, %v437_v19 }
  0xda   :  { %v222_v30 = vrot.slane %v221_v25, 4  ;;  %v259_v31 = vadd.f32 %v258_v24, %v244_v47  ;;  %v416_v62 = vrot.slane %v415_v26, 4  ;;  %v453_v33 = vadd.f32 %v452_v29, %v438_v23 }
  0xdc   :  { %v223_v34 = vadd.f32 %v222_v30, %v221_v25  ;;  %v260_v36 = vrot.slane %v259_v31, 4  ;;  %v417_v10 = vadd.f32 %v416_v62, %v415_v26  ;;  %v454_v38 = vrot.slane %v453_v33, 4 }
  0xde   :  { %v224_v39 = vrot.slane %v223_v34, 2  ;;  %v261_v43 = vadd.f32 %v260_v36, %v259_v31  ;;  %v418_v27 = vrot.slane %v417_v10, 2  ;;  %v455_v44 = vadd.f32 %v454_v38, %v453_v33 }
  0xe0   :  { %v225_v40 = vadd.f32 %v224_v39, %v223_v34  ;;  %v262_v49 = vrot.slane %v261_v43, 2  ;;  %v419_v48 = vadd.f32 %v418_v27, %v417_v10  ;;  %v456_v45 = vrot.slane %v455_v44, 2 }
  0xe2   :  { %v226_v50 = vrot.slane %v225_v40, 1  ;;  %v263_v51 = vadd.f32 %v262_v49, %v261_v43  ;;  %v420_v52 = vrot.slane %v419_v48, 1  ;;  %v457_v53 = vadd.f32 %v456_v45, %v455_v44 }
  0xe4   :  { %v227_v54 = vadd.f32 %v226_v50, %v225_v40  ;;  %v264_v55 = vrot.slane %v263_v51, 1  ;;  %v421_v56 = vadd.f32 %v420_v52, %v419_v48  ;;  %v458_v57 = vrot.slane %v457_v53, 1 }
  0xe6   :  { %228 = vst [vmem:[%s838_s5] sm:$0x1] %v227_v54  ;;  %v265_v58 = vadd.f32 %v264_v55, %v263_v51  ;;  %v459_v59 = vadd.f32 %v458_v57, %v457_v53 }
  0xe7   :  { %422 = vst [vmem:[%s839_s6] sm:$0x1] %v421_v56 }
  0xe8   :  { %266 = vst [vmem:[%s838_s5 + $0x1] sm:$0x1] %v265_v58 }
  0xe9   :  { %460 = vst [vmem:[%s839_s6 + $0x1] sm:$0x1] %v459_v59 }

// kernel: residual_block.7
= control target key start
LH: loop header
LB: loop body
LE: loop exit
PB: predicated region body
PF: predicated region fallthrough
CT: control target
= control target key end

     0   :  { %vm135_vm0 = vcmask 1041408   ;;  %vm110_vm1 = vcmask 31744   ;;  %s643_s2 = inlined_call_operand.vmem [shape: bf16[4,128], index: 2, kind: input, shape index: {}]   ;;  %s644_s1 = inlined_call_operand.vmem [shape: bf16[128,4], index: 1, kind: input, shape index: {}]   ;;  %s645_s3 = inlined_call_operand.vmem [shape: f32[2,128], index: 3, kind: input, shape index: {}]   ;;  %s646_s4 = inlined_call_operand.vmem [shape: f32[2,128], index: 4, kind: input, shape index: {}]   ;;  %s647_s0 = inlined_call_operand.vmem [shape: bf16[128,128], index: 0, kind: input, shape index: {}]   ;;  %s648_s5 = inlined_call_operand.vmem [shape: f32[128,128], index: 5, kind: output, shape index: {}]  }
   0x1   :  { %v69_v0 = vld [vmem:[%s643_s2] sm:$0x3]  ;;  %v354_v3 = vld [vmem:[%s644_s1 + $0x10] sm:$0xff]  ;;  %v353_v6 = vld [vmem:[%s644_s1 + $0x8] sm:$0xff] }
   0x2   :  { %v137_v1 = vsel %vm135_vm0, %v69_v0, 0  ;;  %v352_v2 = vld [vmem:[%s644_s1] sm:$0xff]  ;;  %v358_v5 = vld [vmem:[%s644_s1 + $0x30] sm:$0xff]  ;;  %v355_v7 = vld [vmem:[%s644_s1 + $0x18] sm:$0xff] }
   0x3   :  { %146 = vmatpush.bf16.msra.mxu0 %v137_v1  ;;  %399 = vmatpush.bf16.msra.mxu1 %v137_v1  ;;  %v356_v4 = vld [vmem:[%s644_s1 + $0x20] sm:$0xff]  ;;  %v357_v8 = vld [vmem:[%s644_s1 + $0x28] sm:$0xff]  ;;  %v359_v9 = vld [vmem:[%s644_s1 + $0x38] sm:$0xff] }
   0x4   :  { %400 = vmatpush.bf16.msra.mxu2 %v137_v1  ;;  %401 = vmatpush.bf16.msra.mxu3 %v137_v1  ;;  %v361_v10 = vld [vmem:[%s647_s0] sm:$0xff]   ;;  %v393_v11 = vld [vmem:[%s647_s0 + $0x10] sm:$0xff]   ;;  %v516_v40 = vld [vmem:[%s647_s0 + $0x8] sm:$0xff]  }
   0x5   :  { %v362_v12 = vunpack.c.l.bf16 %v361_v10  ;;  %v480_v13 = vld [vmem:[%s645_s3] ss:$0 sm:$0xff]  ;;  %v370_v14 = vunpack.c.l.bf16 %v393_v11  ;;  %v486_v16 = vld [vmem:[%s645_s3 + $0x1] ss:$0 sm:$0xff]  ;;  %v397_v19 = vld [vmem:[%s647_s0 + $0x30] sm:$0xff]   ;;  %v363_v23 = vunpack.c.h.bf16 %v361_v10  ;;  %v371_v24 = vunpack.c.h.bf16 %v393_v11 }
   0x6   :  { %344 = vmatmul.msk.bf16.vlgmr.msra.gmra.mxu0 %vm110_vm1, %v352_v2  ;;  %346 = vmatmul.msk.bf16.vlgmr.msra.gmra.mxu1 %vm110_vm1, %v354_v3  ;;  %v395_v18 = vld [vmem:[%s647_s0 + $0x20] sm:$0xff]   ;;  %v386_v22 = vunpack.c.l.bf16 %v397_v19  ;;  %v387_v39 = vunpack.c.h.bf16 %v397_v19  ;;  %v521_v41 = vld [vmem:[%s647_s0 + $0x18] sm:$0xff]   ;;  %v366_v52 = vunpack.c.l.bf16 %v516_v40  ;;  %v546_v0 = vld [vmem:[%s647_s0 + $0x28] sm:$0xff]  }
   0x7   :  { %348 = vmatmul.msk.bf16.vlgmr.msra.gmra.mxu2 %vm110_vm1, %v356_v4  ;;  %350 = vmatmul.msk.bf16.vlgmr.msra.gmra.mxu3 %vm110_vm1, %v358_v5  ;;  %v190_v15 = vmul.f32 %v480_v13, %v362_v12  ;;  %v194_v17 = vmul.f32 %v480_v13, %v370_v14  ;;  %v498_v20 = vld [vmem:[%s646_s4] ss:$0 sm:$0xff]  ;;  %v378_v21 = vunpack.c.l.bf16 %v395_v18  ;;  %v506_v30 = vld [vmem:[%s646_s4 + $0x1] ss:$0 sm:$0xff]  ;;  %v191_v34 = vmul.f32 %v480_v13, %v363_v23  ;;  %v551_v1 = vld [vmem:[%s647_s0 + $0x38] sm:$0xff]  }
   0x8   :  { %v202_v33 = vmul.f32 %v480_v13, %v386_v22  ;;  %v195_v35 = vmul.f32 %v480_v13, %v371_v24  ;;  %v379_v38 = vunpack.c.h.bf16 %v395_v18  ;;  %v374_v53 = vunpack.c.l.bf16 %v521_v41 }
   0x9   :  { %v208_v25 = vadd.f32 %v486_v16, %v190_v15  ;;  %v212_v26 = vadd.f32 %v486_v16, %v194_v17  ;;  %v198_v32 = vmul.f32 %v480_v13, %v378_v21  ;;  %v209_v46 = vadd.f32 %v486_v16, %v191_v34 }
   0xa   :  { %v220_v45 = vadd.f32 %v486_v16, %v202_v33  ;;  %v213_v47 = vadd.f32 %v486_v16, %v195_v35  ;;  %v199_v58 = vmul.f32 %v480_v13, %v379_v38  ;;  %v203_v59 = vmul.f32 %v480_v13, %v387_v39 }
   0xb   :  { %v216_v44 = vadd.f32 %v486_v16, %v198_v32  ;;  %v192_v4 = vmul.f32 %v480_v13, %v366_v52  ;;  %v196_v5 = vmul.f32 %v480_v13, %v374_v53  ;;  %v382_v12 = vunpack.c.l.bf16 %v546_v0 }
   0xc   :  { %v390_v14 = vunpack.c.l.bf16 %v551_v1  ;;  %v367_v18 = vunpack.c.h.bf16 %v516_v40  ;;  %v375_v19 = vunpack.c.h.bf16 %v521_v41 }
   0xd   :  { %v200_v34 = vmul.f32 %v480_v13, %v382_v12 }
   0xe   :  { %v204_v35 = vmul.f32 %v480_v13, %v390_v14  ;;  %v193_v40 = vmul.f32 %v480_v13, %v367_v18  ;;  %v197_v41 = vmul.f32 %v480_v13, %v375_v19 }
  0x16   :  { %345 = vmatmul.msk.bf16.gmra.mxu0 %vm110_vm1, %v353_v6  ;;  %347 = vmatmul.msk.bf16.gmra.mxu1 %vm110_vm1, %v355_v7 }
  0x17   :  { %349 = vmatmul.msk.bf16.gmra.mxu2 %vm110_vm1, %v357_v8  ;;  %351 = vmatmul.msk.bf16.gmra.mxu3 %vm110_vm1, %v359_v9  ;;  %v217_v8 = vadd.f32 %v486_v16, %v199_v58  ;;  %v221_v9 = vadd.f32 %v486_v16, %v203_v59 }
  0x83   :  { %v148_v27 = vpop.f32.mrf.mxu0  ;;  %v158_v28 = vpop.f32.mrf.mxu1 }
  0x84   :  { %v226_v29 = vmul.f32 %v498_v20, %v148_v27  ;;  %v230_v31 = vmul.f32 %v498_v20, %v158_v28 }
  0x86   :  { %v242_v36 = vadd.f32 %v226_v29, %v208_v25  ;;  %v246_v37 = vadd.f32 %v230_v31, %v212_v26  ;;  %v210_v25 = vadd.f32 %v486_v16, %v192_v4  ;;  %v214_v26 = vadd.f32 %v486_v16, %v196_v5 }
  0x88   :  { %v260_v42 = vadd.f32 %v506_v30, %v242_v36  ;;  %v264_v43 = vadd.f32 %v506_v30, %v246_v37 }
  0x8a   :  { %v276_v48 = vmax.f32 %v260_v42, 0.0  ;;  %v280_v49 = vmax.f32 %v264_v43, 0.0  ;;  %v168_v50 = vpop.f32.mrf.mxu2  ;;  %v178_v51 = vpop.f32.mrf.mxu3 }
  0x8b   :  { %v234_v54 = vmul.f32 %v498_v20, %v168_v50  ;;  %v238_v55 = vmul.f32 %v498_v20, %v178_v51  ;;  %v150_v56 = vpop.f32.mrf.mxu0  ;;  %v160_v57 = vpop.f32.mrf.mxu1  ;;  %v383_v50 = vunpack.c.h.bf16 %v546_v0  ;;  %v391_v51 = vunpack.c.h.bf16 %v551_v1 }
  0x8c   :  { %292 = vst [vmem:[%s648_s5] sm:$0xff] %v276_v48  ;;  %v227_v60 = vmul.f32 %v498_v20, %v150_v56  ;;  %v231_v61 = vmul.f32 %v498_v20, %v160_v57  ;;  %v211_v56 = vadd.f32 %v486_v16, %v193_v40  ;;  %v215_v57 = vadd.f32 %v486_v16, %v197_v41 }
  0x8d   :  { %296 = vst [vmem:[%s648_s5 + $0x20] sm:$0xff] %v280_v49  ;;  %v250_v62 = vadd.f32 %v234_v54, %v216_v44  ;;  %v254_v63 = vadd.f32 %v238_v55, %v220_v45 }
  0x8e   :  { %v243_v2 = vadd.f32 %v227_v60, %v209_v46  ;;  %v247_v3 = vadd.f32 %v231_v61, %v213_v47  ;;  %v218_v46 = vadd.f32 %v486_v16, %v200_v34  ;;  %v222_v47 = vadd.f32 %v486_v16, %v204_v35 }
  0x8f   :  { %v268_v6 = vadd.f32 %v506_v30, %v250_v62  ;;  %v272_v7 = vadd.f32 %v506_v30, %v254_v63 }
  0x90   :  { %v261_v10 = vadd.f32 %v506_v30, %v243_v2  ;;  %v265_v11 = vadd.f32 %v506_v30, %v247_v3  ;;  %v201_v2 = vmul.f32 %v480_v13, %v383_v50  ;;  %v205_v3 = vmul.f32 %v480_v13, %v391_v51 }
  0x91   :  { %v284_v15 = vmax.f32 %v268_v6, 0.0  ;;  %v288_v17 = vmax.f32 %v272_v7, 0.0 }
  0x92   :  { %v277_v21 = vmax.f32 %v261_v10, 0.0  ;;  %v281_v22 = vmax.f32 %v265_v11, 0.0  ;;  %v170_v23 = vpop.f32.mrf.mxu2  ;;  %v180_v24 = vpop.f32.mrf.mxu3  ;;  %v219_v12 = vadd.f32 %v486_v16, %v201_v2  ;;  %v223_v13 = vadd.f32 %v486_v16, %v205_v3 }
  0x93   :  { %300 = vst [vmem:[%s648_s5 + $0x40] sm:$0xff] %v284_v15  ;;  %v235_v27 = vmul.f32 %v498_v20, %v170_v23  ;;  %v239_v28 = vmul.f32 %v498_v20, %v180_v24  ;;  %v153_v29 = vpop.f32.mrf.mxu0  ;;  %v163_v31 = vpop.f32.mrf.mxu1 }
  0x94   :  { %304 = vst [vmem:[%s648_s5 + $0x60] sm:$0xff] %v288_v17  ;;  %v228_v32 = vmul.f32 %v498_v20, %v153_v29  ;;  %v232_v33 = vmul.f32 %v498_v20, %v163_v31 }
  0x95   :  { %293 = vst [vmem:[%s648_s5 + $0x8] sm:$0xff] %v277_v21  ;;  %v251_v36 = vadd.f32 %v235_v27, %v217_v8  ;;  %v255_v37 = vadd.f32 %v239_v28, %v221_v9 }
  0x96   :  { %297 = vst [vmem:[%s648_s5 + $0x28] sm:$0xff] %v281_v22  ;;  %v244_v38 = vadd.f32 %v228_v32, %v210_v25  ;;  %v248_v39 = vadd.f32 %v232_v33, %v214_v26 }
  0x97   :  { %v269_v42 = vadd.f32 %v506_v30, %v251_v36  ;;  %v273_v43 = vadd.f32 %v506_v30, %v255_v37 }
  0x98   :  { %v262_v44 = vadd.f32 %v506_v30, %v244_v38  ;;  %v266_v45 = vadd.f32 %v506_v30, %v248_v39 }
  0x99   :  { %v285_v48 = vmax.f32 %v269_v42, 0.0  ;;  %v289_v49 = vmax.f32 %v273_v43, 0.0 }
  0x9a   :  { %v278_v52 = vmax.f32 %v262_v44, 0.0  ;;  %v282_v53 = vmax.f32 %v266_v45, 0.0  ;;  %v173_v54 = vpop.f32.mrf.mxu2  ;;  %v183_v55 = vpop.f32.mrf.mxu3 }
  0x9b   :  { %301 = vst [vmem:[%s648_s5 + $0x48] sm:$0xff] %v285_v48  ;;  %v236_v58 = vmul.f32 %v498_v20, %v173_v54  ;;  %v240_v59 = vmul.f32 %v498_v20, %v183_v55  ;;  %v155_v60 = vpop.f32.mrf.mxu0  ;;  %v165_v61 = vpop.f32.mrf.mxu1 }
  0x9c   :  { %305 = vst [vmem:[%s648_s5 + $0x68] sm:$0xff] %v289_v49  ;;  %v229_v62 = vmul.f32 %v498_v20, %v155_v60  ;;  %v233_v63 = vmul.f32 %v498_v20, %v165_v61 }
  0x9d   :  { %294 = vst [vmem:[%s648_s5 + $0x10] sm:$0xff] %v278_v52  ;;  %v252_v0 = vadd.f32 %v236_v58, %v218_v46  ;;  %v256_v1 = vadd.f32 %v240_v59, %v222_v47 }
  0x9e   :  { %298 = vst [vmem:[%s648_s5 + $0x30] sm:$0xff] %v282_v53  ;;  %v245_v4 = vadd.f32 %v229_v62, %v211_v56  ;;  %v249_v5 = vadd.f32 %v233_v63, %v215_v57 }
  0x9f   :  { %v270_v6 = vadd.f32 %v506_v30, %v252_v0  ;;  %v274_v7 = vadd.f32 %v506_v30, %v256_v1 }
  0xa0   :  { %v263_v8 = vadd.f32 %v506_v30, %v245_v4  ;;  %v267_v9 = vadd.f32 %v506_v30, %v249_v5 }
  0xa1   :  { %v286_v10 = vmax.f32 %v270_v6, 0.0  ;;  %v290_v11 = vmax.f32 %v274_v7, 0.0 }
  0xa2   :  { %v279_v14 = vmax.f32 %v263_v8, 0.0  ;;  %v283_v15 = vmax.f32 %v267_v9, 0.0  ;;  %v175_v17 = vpop.f32.mrf.mxu2  ;;  %v185_v18 = vpop.f32.mrf.mxu3 }
  0xa3   :  { %302 = vst [vmem:[%s648_s5 + $0x50] sm:$0xff] %v286_v10  ;;  %v237_v19 = vmul.f32 %v498_v20, %v175_v17  ;;  %v241_v21 = vmul.f32 %v498_v20, %v185_v18 }
  0xa4   :  { %306 = vst [vmem:[%s648_s5 + $0x70] sm:$0xff] %v290_v11 }
  0xa5   :  { %295 = vst [vmem:[%s648_s5 + $0x18] sm:$0xff] %v279_v14  ;;  %v253_v16 = vadd.f32 %v237_v19, %v219_v12  ;;  %v257_v22 = vadd.f32 %v241_v21, %v223_v13 }
  0xa6   :  { %299 = vst [vmem:[%s648_s5 + $0x38] sm:$0xff] %v283_v15 }
  0xa7   :  { %v271_v23 = vadd.f32 %v506_v30, %v253_v16  ;;  %v275_v24 = vadd.f32 %v506_v30, %v257_v22 }
  0xa9   :  { %v287_v25 = vmax.f32 %v271_v23, 0.0  ;;  %v291_v20 = vmax.f32 %v275_v24, 0.0 }
  0xab   :  { %303 = vst [vmem:[%s648_s5 + $0x58] sm:$0xff] %v287_v25 }
  0xac   :  { %307 = vst [vmem:[%s648_s5 + $0x78] sm:$0xff] %v291_v20 }

// kernel: residual_block.6
= control target key start
LH: loop header
LB: loop body
LE: loop exit
PB: predicated region body
PF: predicated region fallthrough
CT: control target
= control target key end

     0   :  { %s3151_s1 = inlined_call_operand.vmem [shape: bf16[1152,128], index: 1, kind: input, shape index: {}]   ;;  %s3152_s0 = inlined_call_operand.vmem [shape: bf16[128,1152], index: 0, kind: input, shape index: {}]   ;;  %s3153_s2 = inlined_call_operand.vmem [shape: bf16[128,128], index: 2, kind: output, shape index: {0}]   ;;  %s3154_s3 = inlined_call_operand.vmem [shape: f32[1,2,128], index: 3, kind: output, shape index: {1}]  }
   0x1   :  { %v2233_v0 = vld [vmem:[%s3151_s1 + $0x38] sm:$0xff]  ;;  %v2232_v1 = vld [vmem:[%s3151_s1 + $0x30] sm:$0xff]  ;;  %v2231_v2 = vld [vmem:[%s3151_s1 + $0x28] sm:$0xff] }
   0x2   :  { %2345 = vmatpush.bf16.msra.mxu1 %v2233_v0  ;;  %2346 = vmatpush.bf16.msra.mxu2 %v2233_v0  ;;  %v2230_v3 = vld [vmem:[%s3151_s1 + $0x20] sm:$0xff]  ;;  %v2229_v4 = vld [vmem:[%s3151_s1 + $0x18] sm:$0xff]  ;;  %v2228_v5 = vld [vmem:[%s3151_s1 + $0x10] sm:$0xff] }
   0x3   :  { %2347 = vmatpush.bf16.msra.mxu3 %v2233_v0  ;;  %1037 = vmatpush.bf16.msra.mxu0 %v2233_v0  ;;  %v2227_v6 = vld [vmem:[%s3151_s1 + $0x8] sm:$0xff]  ;;  %v2226_v7 = vld [vmem:[%s3151_s1] sm:$0xff]  ;;  %v1652_v8 = vld [vmem:[%s3152_s0 + $0x90] sm:$0xf] }
   0x4   :  { %v2176_v9 = vld [vmem:[%s3152_s0 + $0xb0] sm:$0xf0]  ;;  %v1724_v10 = vld [vmem:[%s3152_s0 + $0x120] sm:$0xf]  ;;  %v2194_v11 = vld [vmem:[%s3152_s0 + $0x140] sm:$0xf0] }
   0x5   :  { %v1796_v12 = vld [vmem:[%s3152_s0 + $0x1b0] sm:$0xf]  ;;  %v2212_v13 = vld [vmem:[%s3152_s0 + $0x1d0] sm:$0xf0]  ;;  %v1580_v14 = vld [vmem:[%s3152_s0] sm:$0xf]  ;;  %v1653_v18 = vor.u32 %v2176_v9, %v1652_v8  ;;  %v1725_v19 = vor.u32 %v2194_v11, %v1724_v10 }
   0x6   :  { %2348 = vmatpush.bf16.msra.mxu1 %v2232_v1  ;;  %2349 = vmatpush.bf16.msra.mxu2 %v2232_v1  ;;  %v2158_v15 = vld [vmem:[%s3152_s0 + $0x20] sm:$0xf0]  ;;  %v2249_v16 = vld [vmem:[%s3151_s1 + $0xb8] sm:$0xff]  ;;  %v1797_v20 = vor.u32 %v2212_v13, %v1796_v12  ;;  %v2248_v24 = vld [vmem:[%s3151_s1 + $0xb0] sm:$0xff] }
   0x7   :  { %2350 = vmatpush.bf16.msra.mxu3 %v2232_v1  ;;  %1038 = vmatpush.bf16.msra.mxu0 %v2232_v1  ;;  %v2241_v17 = vld [vmem:[%s3151_s1 + $0x78] sm:$0xff]  ;;  %v1581_v21 = vor.u32 %v2158_v15, %v1580_v14  ;;  %v2240_v25 = vld [vmem:[%s3151_s1 + $0x70] sm:$0xff]  ;;  %v2247_v28 = vld [vmem:[%s3151_s1 + $0xa8] sm:$0xff] }
   0x8   :  { %v2257_v22 = vld [vmem:[%s3151_s1 + $0xf8] sm:$0xff]  ;;  %v2256_v26 = vld [vmem:[%s3151_s1 + $0xf0] sm:$0xff]  ;;  %v2239_v29 = vld [vmem:[%s3151_s1 + $0x68] sm:$0xff] }
   0x9   :  { %v2265_v23 = vld [vmem:[%s3151_s1 + $0x138] sm:$0xff]  ;;  %v2264_v27 = vld [vmem:[%s3151_s1 + $0x130] sm:$0xff]  ;;  %v2255_v30 = vld [vmem:[%s3151_s1 + $0xe8] sm:$0xff] }
   0xa   :  { %2351 = vmatpush.bf16.msra.mxu1 %v2231_v2  ;;  %2352 = vmatpush.bf16.msra.mxu2 %v2231_v2  ;;  %v2263_v31 = vld [vmem:[%s3151_s1 + $0x128] sm:$0xff]  ;;  %v2246_v32 = vld [vmem:[%s3151_s1 + $0xa0] sm:$0xff]  ;;  %v1688_v36 = vld [vmem:[%s3152_s0 + $0xd8] sm:$0xf] }
   0xb   :  { %2353 = vmatpush.bf16.msra.mxu3 %v2231_v2  ;;  %1039 = vmatpush.bf16.msra.mxu0 %v2231_v2  ;;  %v2238_v33 = vld [vmem:[%s3151_s1 + $0x60] sm:$0xff]  ;;  %v2185_v37 = vld [vmem:[%s3152_s0 + $0xf8] sm:$0xf0]  ;;  %v1760_v38 = vld [vmem:[%s3152_s0 + $0x168] sm:$0xf] }
   0xc   :  { %v2254_v34 = vld [vmem:[%s3151_s1 + $0xe0] sm:$0xff]  ;;  %v2203_v39 = vld [vmem:[%s3152_s0 + $0x188] sm:$0xf0]  ;;  %v1832_v40 = vld [vmem:[%s3152_s0 + $0x1f8] sm:$0xf]  ;;  %v1689_v46 = vor.u32 %v2185_v37, %v1688_v36 }
   0xd   :  { %v2262_v35 = vld [vmem:[%s3151_s1 + $0x120] sm:$0xff]  ;;  %v2221_v41 = vld [vmem:[%s3152_s0 + $0x218] sm:$0xf0]  ;;  %v1616_v42 = vld [vmem:[%s3152_s0 + $0x48] sm:$0xf]  ;;  %v1761_v47 = vor.u32 %v2203_v39, %v1760_v38 }
   0xe   :  { %2354 = vmatpush.bf16.msra.mxu1 %v2230_v3  ;;  %2355 = vmatpush.bf16.msra.mxu2 %v2230_v3  ;;  %v2167_v43 = vld [vmem:[%s3152_s0 + $0x68] sm:$0xf0]  ;;  %v2245_v44 = vld [vmem:[%s3151_s1 + $0x98] sm:$0xff]  ;;  %v1833_v48 = vor.u32 %v2221_v41, %v1832_v40  ;;  %v2244_v52 = vld [vmem:[%s3151_s1 + $0x90] sm:$0xff] }
   0xf   :  { %2356 = vmatpush.bf16.msra.mxu3 %v2230_v3  ;;  %1040 = vmatpush.bf16.msra.mxu0 %v2230_v3  ;;  %v2237_v45 = vld [vmem:[%s3151_s1 + $0x58] sm:$0xff]  ;;  %v1617_v49 = vor.u32 %v2167_v43, %v1616_v42  ;;  %v2236_v53 = vld [vmem:[%s3151_s1 + $0x50] sm:$0xff]  ;;  %v2243_v56 = vld [vmem:[%s3151_s1 + $0x88] sm:$0xff] }
  0x10   :  { %v2253_v50 = vld [vmem:[%s3151_s1 + $0xd8] sm:$0xff]  ;;  %v2252_v54 = vld [vmem:[%s3151_s1 + $0xd0] sm:$0xff]  ;;  %v2235_v57 = vld [vmem:[%s3151_s1 + $0x48] sm:$0xff] }
  0x11   :  { %v2261_v51 = vld [vmem:[%s3151_s1 + $0x118] sm:$0xff]  ;;  %v2260_v55 = vld [vmem:[%s3151_s1 + $0x110] sm:$0xff]  ;;  %v2251_v58 = vld [vmem:[%s3151_s1 + $0xc8] sm:$0xff] }
  0x12   :  { %2357 = vmatpush.bf16.msra.mxu1 %v2229_v4  ;;  %2358 = vmatpush.bf16.msra.mxu2 %v2229_v4  ;;  %v2259_v59 = vld [vmem:[%s3151_s1 + $0x108] sm:$0xff]  ;;  %v2242_v60 = vld [vmem:[%s3151_s1 + $0x80] sm:$0xff]  ;;  %v2281_v2 = vld [vmem:[%s3151_s1 + $0x1b8] sm:$0xff] }
  0x13   :  { %2359 = vmatpush.bf16.msra.mxu3 %v2229_v4  ;;  %1041 = vmatpush.bf16.msra.mxu0 %v2229_v4  ;;  %v2234_v61 = vld [vmem:[%s3151_s1 + $0x40] sm:$0xff]  ;;  %v1582_v1 = vld [vmem:[%s3152_s0 + $0x24] sm:$0xf0]  ;;  %v2273_v3 = vld [vmem:[%s3151_s1 + $0x178] sm:$0xff] }
  0x14   :  { %v2154_v62 = vld [vmem:[%s3152_s0 + $0x4] sm:$0xf]  ;;  %v1588_v4 = vld [vmem:[%s3152_s0 + $0x8] sm:$0xf]  ;;  %v1596_v8 = vld [vmem:[%s3152_s0 + $0x10] sm:$0xf] }
  0x15   :  { %v2250_v63 = vld [vmem:[%s3151_s1 + $0xc0] sm:$0xff]  ;;  %v2160_v9 = vld [vmem:[%s3152_s0 + $0x30] sm:$0xf0]  ;;  %v2289_v10 = vld [vmem:[%s3151_s1 + $0x1f8] sm:$0xff]  ;;  %v1585_v12 = vor.u32 %v2154_v62, %v1582_v1 }
  0x16   :  { %2360 = vmatpush.bf16.msra.mxu1 %v2228_v5  ;;  %2361 = vmatpush.bf16.msra.mxu2 %v2228_v5  ;;  %v2258_v0 = vld [vmem:[%s3151_s1 + $0x100] sm:$0xff]  ;;  %v2297_v11 = vld [vmem:[%s3151_s1 + $0x238] sm:$0xff]  ;;  %v1597_v15 = vor.u32 %v2160_v9, %v1596_v8  ;;  %v2172_v40 = vld [vmem:[%s3152_s0 + $0x94] sm:$0xf] }
  0x17   :  { %2362 = vmatpush.bf16.msra.mxu3 %v2228_v5  ;;  %1042 = vmatpush.bf16.msra.mxu0 %v2228_v5  ;;  %v2159_v5 = vld [vmem:[%s3152_s0 + $0x28] sm:$0xf0]  ;;  %v2278_v36 = vld [vmem:[%s3151_s1 + $0x1a0] sm:$0xff]  ;;  %v1654_v41 = vld [vmem:[%s3152_s0 + $0xb4] sm:$0xf0] }
  0x18   :  { %v1589_v13 = vor.u32 %v2159_v5, %v1588_v4  ;;  %v2286_v37 = vld [vmem:[%s3151_s1 + $0x1e0] sm:$0xff]  ;;  %v1660_v42 = vld [vmem:[%s3152_s0 + $0x98] sm:$0xf]  ;;  %v2177_v43 = vld [vmem:[%s3152_s0 + $0xb8] sm:$0xf0] }
  0x19   :  { %v2270_v38 = vld [vmem:[%s3151_s1 + $0x160] sm:$0xff]  ;;  %v1704_v62 = vld [vmem:[%s3152_s0 + $0xe8] sm:$0xf]  ;;  %v2276_v4 = vld [vmem:[%s3151_s1 + $0x190] sm:$0xff] }
  0x1a   :  { %2363 = vmatpush.bf16.msra.mxu1 %v2227_v6  ;;  %2364 = vmatpush.bf16.msra.mxu2 %v2227_v6  ;;  %v2294_v39 = vld [vmem:[%s3151_s1 + $0x220] sm:$0xff]  ;;  %v2284_v5 = vld [vmem:[%s3151_s1 + $0x1d0] sm:$0xff]  ;;  %v1726_v9 = vld [vmem:[%s3152_s0 + $0x144] sm:$0xf0] }
  0x1b   :  { %2365 = vmatpush.bf16.msra.mxu3 %v2227_v6  ;;  %1043 = vmatpush.bf16.msra.mxu0 %v2227_v6  ;;  %v2155_v6 = vld [vmem:[%s3152_s0 + $0xc] sm:$0xf]  ;;  %v2190_v8 = vld [vmem:[%s3152_s0 + $0x124] sm:$0xf] }
  0x1e   :  { %2366 = vmatpush.bf16.msra.mxu1 %v2226_v7  ;;  %2367 = vmatpush.bf16.msra.mxu2 %v2226_v7 }
  0x1f   :  { %2368 = vmatpush.bf16.msra.mxu3 %v2226_v7  ;;  %1044 = vmatpush.bf16.msra.mxu0 %v2226_v7  ;;  %v1590_v7 = vld [vmem:[%s3152_s0 + $0x2c] sm:$0xf0] }
  0x20   :  { %v1593_v14 = vor.u32 %v2155_v6, %v1590_v7  ;;  %v2268_v6 = vld [vmem:[%s3151_s1 + $0x150] sm:$0xff] }
  0x21   :  { %1055 = vmatmul.bf16.vlgmr.msra.gmra.mxu1 %v1653_v18  ;;  %1065 = vmatmul.bf16.vlgmr.msra.gmra.mxu2 %v1725_v19  ;;  %v2288_v18 = vld [vmem:[%s3151_s1 + $0x1f0] sm:$0xff] }
  0x22   :  { %1135 = vmatpush.bf16.msrb.mxu2 %v2249_v16  ;;  %1086 = vmatpush.bf16.msrb.mxu1 %v2241_v17  ;;  %v2280_v16 = vld [vmem:[%s3151_s1 + $0x1b0] sm:$0xff] }
  0x23   :  { %1075 = vmatmul.bf16.vlgmr.msra.gmra.mxu3 %v1797_v20  ;;  %1045 = vmatmul.bf16.vlgmr.msra.gmra.mxu0 %v1581_v21  ;;  %v2272_v17 = vld [vmem:[%s3151_s1 + $0x170] sm:$0xff]  ;;  %v2279_v20 = vld [vmem:[%s3151_s1 + $0x1a8] sm:$0xff] }
  0x24   :  { %1184 = vmatpush.bf16.msrb.mxu3 %v2257_v22  ;;  %1233 = vmatpush.bf16.msrb.mxu0 %v2265_v23  ;;  %v2296_v19 = vld [vmem:[%s3151_s1 + $0x230] sm:$0xff]  ;;  %v2271_v21 = vld [vmem:[%s3151_s1 + $0x168] sm:$0xff] }
  0x25   :  { %v2287_v22 = vld [vmem:[%s3151_s1 + $0x1e8] sm:$0xff]  ;;  %v2292_v7 = vld [vmem:[%s3151_s1 + $0x210] sm:$0xff] }
  0x26   :  { %1136 = vmatpush.bf16.msrb.mxu2 %v2248_v24  ;;  %1087 = vmatpush.bf16.msrb.mxu1 %v2240_v25  ;;  %v2295_v23 = vld [vmem:[%s3151_s1 + $0x228] sm:$0xff]  ;;  %v1618_v25 = vld [vmem:[%s3152_s0 + $0x6c] sm:$0xf0] }
  0x27   :  { %v2163_v24 = vld [vmem:[%s3152_s0 + $0x4c] sm:$0xf] }
  0x28   :  { %1185 = vmatpush.bf16.msrb.mxu3 %v2256_v26  ;;  %1234 = vmatpush.bf16.msrb.mxu0 %v2264_v27  ;;  %v1624_v26 = vld [vmem:[%s3152_s0 + $0x50] sm:$0xf]  ;;  %v2168_v27 = vld [vmem:[%s3152_s0 + $0x70] sm:$0xf0] }
  0x2a   :  { %1137 = vmatpush.bf16.msrb.mxu2 %v2247_v28  ;;  %1088 = vmatpush.bf16.msrb.mxu1 %v2239_v29  ;;  %v2164_v28 = vld [vmem:[%s3152_s0 + $0x54] sm:$0xf]  ;;  %v1626_v29 = vld [vmem:[%s3152_s0 + $0x74] sm:$0xf0] }
  0x2c   :  { %1186 = vmatpush.bf16.msrb.mxu3 %v2255_v30  ;;  %1235 = vmatpush.bf16.msrb.mxu0 %v2263_v31  ;;  %v1632_v30 = vld [vmem:[%s3152_s0 + $0x58] sm:$0xf]  ;;  %v2169_v31 = vld [vmem:[%s3152_s0 + $0x78] sm:$0xf0] }
  0x2e   :  { %1138 = vmatpush.bf16.msrb.mxu2 %v2246_v32  ;;  %1089 = vmatpush.bf16.msrb.mxu1 %v2238_v33  ;;  %v1621_v32 = vor.u32 %v2163_v24, %v1618_v25  ;;  %v1625_v33 = vor.u32 %v2168_v27, %v1624_v26  ;;  %v2199_v24 = vld [vmem:[%s3152_s0 + $0x16c] sm:$0xf]  ;;  %v1762_v25 = vld [vmem:[%s3152_s0 + $0x18c] sm:$0xf0]  ;;  %v2204_v27 = vld [vmem:[%s3152_s0 + $0x190] sm:$0xf0] }
  0x2f   :  { %v1768_v26 = vld [vmem:[%s3152_s0 + $0x170] sm:$0xf] }
  0x30   :  { %1187 = vmatpush.bf16.msrb.mxu3 %v2254_v34  ;;  %1236 = vmatpush.bf16.msrb.mxu0 %v2262_v35  ;;  %v1629_v34 = vor.u32 %v2164_v28, %v1626_v29  ;;  %v1633_v35 = vor.u32 %v2169_v31, %v1632_v30  ;;  %v2200_v28 = vld [vmem:[%s3152_s0 + $0x174] sm:$0xf]  ;;  %v1770_v29 = vld [vmem:[%s3152_s0 + $0x194] sm:$0xf0]  ;;  %v2205_v31 = vld [vmem:[%s3152_s0 + $0x198] sm:$0xf0] }
  0x31   :  { %1060 = vmatmul.bf16.gmra.mxu1 %v1689_v46  ;;  %1070 = vmatmul.bf16.gmra.mxu2 %v1761_v47  ;;  %v1668_v46 = vld [vmem:[%s3152_s0 + $0xa0] sm:$0xf]  ;;  %v2178_v47 = vld [vmem:[%s3152_s0 + $0xc0] sm:$0xf0]  ;;  %v1776_v30 = vld [vmem:[%s3152_s0 + $0x178] sm:$0xf] }
  0x32   :  { %1139 = vmatpush.bf16.msrb.mxu2 %v2245_v44  ;;  %1090 = vmatpush.bf16.msrb.mxu1 %v2237_v45  ;;  %v2173_v44 = vld [vmem:[%s3152_s0 + $0x9c] sm:$0xf]  ;;  %v1662_v45 = vld [vmem:[%s3152_s0 + $0xbc] sm:$0xf0] }
  0x33   :  { %1080 = vmatmul.bf16.gmra.mxu3 %v1833_v48  ;;  %1050 = vmatmul.bf16.gmra.mxu0 %v1617_v49  ;;  %v1657_v48 = vor.u32 %v2172_v40, %v1654_v41  ;;  %v1661_v49 = vor.u32 %v2177_v43, %v1660_v42  ;;  %v2208_v40 = vld [vmem:[%s3152_s0 + $0x1b4] sm:$0xf]  ;;  %v1798_v41 = vld [vmem:[%s3152_s0 + $0x1d4] sm:$0xf0]  ;;  %v2213_v43 = vld [vmem:[%s3152_s0 + $0x1d8] sm:$0xf0] }
  0x34   :  { %1188 = vmatpush.bf16.msrb.mxu3 %v2253_v50  ;;  %1237 = vmatpush.bf16.msrb.mxu0 %v2261_v51  ;;  %v1665_v50 = vor.u32 %v2173_v44, %v1662_v45  ;;  %v1669_v51 = vor.u32 %v2178_v47, %v1668_v46  ;;  %v1804_v42 = vld [vmem:[%s3152_s0 + $0x1b8] sm:$0xf]  ;;  %v2209_v44 = vld [vmem:[%s3152_s0 + $0x1bc] sm:$0xf]  ;;  %v1806_v45 = vld [vmem:[%s3152_s0 + $0x1dc] sm:$0xf0] }
  0x35   :  { %v1812_v46 = vld [vmem:[%s3152_s0 + $0x1c0] sm:$0xf]  ;;  %v2214_v47 = vld [vmem:[%s3152_s0 + $0x1e0] sm:$0xf0] }
  0x36   :  { %1140 = vmatpush.bf16.msrb.mxu2 %v2244_v52  ;;  %1091 = vmatpush.bf16.msrb.mxu1 %v2236_v53  ;;  %v2277_v52 = vld [vmem:[%s3151_s1 + $0x198] sm:$0xff] }
  0x37   :  { %v2285_v53 = vld [vmem:[%s3151_s1 + $0x1d8] sm:$0xff] }
  0x38   :  { %1189 = vmatpush.bf16.msrb.mxu3 %v2252_v54  ;;  %1238 = vmatpush.bf16.msrb.mxu0 %v2260_v55  ;;  %v2269_v54 = vld [vmem:[%s3151_s1 + $0x158] sm:$0xff] }
  0x39   :  { %v2293_v55 = vld [vmem:[%s3151_s1 + $0x218] sm:$0xff] }
  0x3a   :  { %1141 = vmatpush.bf16.msrb.mxu2 %v2243_v56  ;;  %1092 = vmatpush.bf16.msrb.mxu1 %v2235_v57  ;;  %v2181_v56 = vld [vmem:[%s3152_s0 + $0xdc] sm:$0xf]  ;;  %v1690_v57 = vld [vmem:[%s3152_s0 + $0xfc] sm:$0xf0] }
  0x3c   :  { %1190 = vmatpush.bf16.msrb.mxu3 %v2251_v58  ;;  %1239 = vmatpush.bf16.msrb.mxu0 %v2259_v59  ;;  %v1696_v58 = vld [vmem:[%s3152_s0 + $0xe0] sm:$0xf]  ;;  %v2186_v59 = vld [vmem:[%s3152_s0 + $0x100] sm:$0xf0] }
  0x3d   :  { %v1697_v1 = vor.u32 %v2186_v59, %v1696_v58  ;;  %v2217_v58 = vld [vmem:[%s3152_s0 + $0x1fc] sm:$0xf]  ;;  %v1834_v59 = vld [vmem:[%s3152_s0 + $0x21c] sm:$0xf0] }
  0x3e   :  { %1142 = vmatpush.bf16.msrb.mxu2 %v2242_v60  ;;  %1093 = vmatpush.bf16.msrb.mxu1 %v2234_v61  ;;  %v2182_v60 = vld [vmem:[%s3152_s0 + $0xe4] sm:$0xf]  ;;  %v1698_v61 = vld [vmem:[%s3152_s0 + $0x104] sm:$0xf0] }
  0x40   :  { %1191 = vmatpush.bf16.msrb.mxu3 %v2250_v63  ;;  %1240 = vmatpush.bf16.msrb.mxu0 %v2258_v0  ;;  %v2187_v63 = vld [vmem:[%s3152_s0 + $0x108] sm:$0xf0]  ;;  %v1693_v0 = vor.u32 %v2181_v56, %v1690_v57 }
  0x41   :  { %1094 = vmatmul.bf16.vlgmr.msrb.gmra.mxu1 %v1585_v12  ;;  %1143 = vmatmul.bf16.vlgmr.msrb.gmra.mxu2 %v1589_v13  ;;  %v2191_v12 = vld [vmem:[%s3152_s0 + $0x12c] sm:$0xf]  ;;  %v1734_v13 = vld [vmem:[%s3152_s0 + $0x14c] sm:$0xf0] }
  0x42   :  { %1331 = vmatpush.bf16.msra.mxu2 %v2281_v2  ;;  %1282 = vmatpush.bf16.msra.mxu1 %v2273_v3  ;;  %v1701_v2 = vor.u32 %v2182_v60, %v1698_v61  ;;  %v1705_v3 = vor.u32 %v2187_v63, %v1704_v62  ;;  %v1840_v60 = vld [vmem:[%s3152_s0 + $0x200] sm:$0xf]  ;;  %v2222_v61 = vld [vmem:[%s3152_s0 + $0x220] sm:$0xf0]  ;;  %v1842_v63 = vld [vmem:[%s3152_s0 + $0x224] sm:$0xf0] }
  0x43   :  { %1192 = vmatmul.bf16.vlgmr.msrb.gmra.mxu3 %v1593_v14  ;;  %1241 = vmatmul.bf16.vlgmr.msrb.gmra.mxu0 %v1597_v15  ;;  %v1740_v14 = vld [vmem:[%s3152_s0 + $0x130] sm:$0xf]  ;;  %v2196_v15 = vld [vmem:[%s3152_s0 + $0x150] sm:$0xf0]  ;;  %v2218_v62 = vld [vmem:[%s3152_s0 + $0x204] sm:$0xf] }
  0x44   :  { %1380 = vmatpush.bf16.msra.mxu3 %v2289_v10  ;;  %1429 = vmatpush.bf16.msra.mxu0 %v2297_v11  ;;  %v1732_v10 = vld [vmem:[%s3152_s0 + $0x128] sm:$0xf]  ;;  %v2195_v11 = vld [vmem:[%s3152_s0 + $0x148] sm:$0xf0] }
  0x46   :  { %1332 = vmatpush.bf16.msra.mxu2 %v2280_v16  ;;  %1283 = vmatpush.bf16.msra.mxu1 %v2272_v17  ;;  %v1729_v16 = vor.u32 %v2190_v8, %v1726_v9  ;;  %v1733_v17 = vor.u32 %v2195_v11, %v1732_v10 }
  0x48   :  { %1381 = vmatpush.bf16.msra.mxu3 %v2288_v18  ;;  %1430 = vmatpush.bf16.msra.mxu0 %v2296_v19  ;;  %v1737_v18 = vor.u32 %v2191_v12, %v1734_v13  ;;  %v1741_v19 = vor.u32 %v2196_v15, %v1740_v14  ;;  %v2156_v14 = vld [vmem:[%s3152_s0 + $0x14] sm:$0xf]  ;;  %v1598_v15 = vld [vmem:[%s3152_s0 + $0x34] sm:$0xf0] }
  0x4a   :  { %1333 = vmatpush.bf16.msra.mxu2 %v2279_v20  ;;  %1284 = vmatpush.bf16.msra.mxu1 %v2271_v21  ;;  %v2275_v20 = vld [vmem:[%s3151_s1 + $0x188] sm:$0xff] }
  0x4b   :  { %v2283_v21 = vld [vmem:[%s3151_s1 + $0x1c8] sm:$0xff] }
  0x4c   :  { %1382 = vmatpush.bf16.msra.mxu3 %v2287_v22  ;;  %1431 = vmatpush.bf16.msra.mxu0 %v2295_v23  ;;  %v2267_v22 = vld [vmem:[%s3151_s1 + $0x148] sm:$0xff] }
  0x4d   :  { %v2291_v23 = vld [vmem:[%s3151_s1 + $0x208] sm:$0xff] }
  0x4e   :  { %1334 = vmatpush.bf16.msra.mxu2 %v2278_v36  ;;  %1285 = vmatpush.bf16.msra.mxu1 %v2270_v38  ;;  %v2274_v36 = vld [vmem:[%s3151_s1 + $0x180] sm:$0xff] }
  0x4f   :  { %v2266_v38 = vld [vmem:[%s3151_s1 + $0x140] sm:$0xff] }
  0x50   :  { %1383 = vmatpush.bf16.msra.mxu3 %v2286_v37  ;;  %1432 = vmatpush.bf16.msra.mxu0 %v2294_v39  ;;  %v2282_v37 = vld [vmem:[%s3151_s1 + $0x1c0] sm:$0xff] }
  0x51   :  { %1099 = vmatmul.bf16.gmra.mxu1 %v1621_v32  ;;  %1148 = vmatmul.bf16.gmra.mxu2 %v1625_v33  ;;  %v1765_v32 = vor.u32 %v2199_v24, %v1762_v25  ;;  %v1769_v33 = vor.u32 %v2204_v27, %v1768_v26  ;;  %v2290_v39 = vld [vmem:[%s3151_s1 + $0x200] sm:$0xff]  ;;  %v1601_v24 = vor.u32 %v2156_v14, %v1598_v15 }
  0x52   :  { %1335 = vmatpush.bf16.msra.mxu2 %v2277_v52  ;;  %1286 = vmatpush.bf16.msra.mxu1 %v2269_v54  ;;  %v1813_v52 = vor.u32 %v2214_v47, %v1812_v46  ;;  %v2171_v46 = vld [vmem:[%s3152_s0 + $0x88] sm:$0xf0]  ;;  %v2174_v14 = vld [vmem:[%s3152_s0 + $0xa4] sm:$0xf] }
  0x53   :  { %1197 = vmatmul.bf16.gmra.mxu3 %v1629_v34  ;;  %1246 = vmatmul.bf16.gmra.mxu0 %v1633_v35  ;;  %v1773_v34 = vor.u32 %v2200_v28, %v1770_v29  ;;  %v1777_v35 = vor.u32 %v2205_v31, %v1776_v30 }
  0x54   :  { %1384 = vmatpush.bf16.msra.mxu3 %v2285_v53  ;;  %1433 = vmatpush.bf16.msra.mxu0 %v2293_v55 }
  0x56   :  { %1336 = vmatpush.bf16.msra.mxu2 %v2276_v4  ;;  %1287 = vmatpush.bf16.msra.mxu1 %v2268_v6  ;;  %v1837_v4 = vor.u32 %v2217_v58, %v1834_v59 }
  0x58   :  { %1385 = vmatpush.bf16.msra.mxu3 %v2284_v5  ;;  %1434 = vmatpush.bf16.msra.mxu0 %v2292_v7  ;;  %v1841_v5 = vor.u32 %v2222_v61, %v1840_v60  ;;  %v1845_v7 = vor.u32 %v2218_v62, %v1842_v63 }
  0x5a   :  { %1337 = vmatpush.bf16.msra.mxu2 %v2275_v20  ;;  %1288 = vmatpush.bf16.msra.mxu1 %v2267_v22  ;;  %v1612_v20 = vld [vmem:[%s3152_s0 + $0x20] sm:$0xf] }
  0x5c   :  { %1386 = vmatpush.bf16.msra.mxu3 %v2283_v21  ;;  %1435 = vmatpush.bf16.msra.mxu0 %v2291_v23  ;;  %v2162_v21 = vld [vmem:[%s3152_s0 + $0x40] sm:$0xf0] }
  0x5d   :  { %v1613_v28 = vor.u32 %v2162_v21, %v1612_v20  ;;  %v2180_v20 = vld [vmem:[%s3152_s0 + $0xd0] sm:$0xf0] }
  0x5e   :  { %1338 = vmatpush.bf16.msra.mxu2 %v2274_v36  ;;  %1289 = vmatpush.bf16.msra.mxu1 %v2266_v38  ;;  %v2165_v38 = vld [vmem:[%s3152_s0 + $0x5c] sm:$0xf] }
  0x60   :  { %1387 = vmatpush.bf16.msra.mxu3 %v2282_v37  ;;  %1436 = vmatpush.bf16.msra.mxu0 %v2290_v39  ;;  %v1634_v39 = vld [vmem:[%s3152_s0 + $0x7c] sm:$0xf0] }
  0x61   :  { %1104 = vmatmul.bf16.gmra.mxu1 %v1657_v48  ;;  %1153 = vmatmul.bf16.gmra.mxu2 %v1661_v49  ;;  %v1801_v48 = vor.u32 %v2208_v40, %v1798_v41  ;;  %v1805_v49 = vor.u32 %v2213_v43, %v1804_v42  ;;  %v1640_v41 = vld [vmem:[%s3152_s0 + $0x60] sm:$0xf]  ;;  %v2170_v42 = vld [vmem:[%s3152_s0 + $0x80] sm:$0xf0] }
  0x62   :  { %v2166_v43 = vld [vmem:[%s3152_s0 + $0x64] sm:$0xf] }
  0x63   :  { %1202 = vmatmul.bf16.gmra.mxu3 %v1665_v50  ;;  %1251 = vmatmul.bf16.gmra.mxu0 %v1669_v51  ;;  %v1809_v51 = vor.u32 %v2209_v44, %v1806_v45  ;;  %v1642_v44 = vld [vmem:[%s3152_s0 + $0x84] sm:$0xf0] }
  0x64   :  { %v1648_v45 = vld [vmem:[%s3152_s0 + $0x68] sm:$0xf] }
  0x65   :  { %v1649_v58 = vor.u32 %v2171_v46, %v1648_v45  ;;  %v1712_v45 = vld [vmem:[%s3152_s0 + $0xf0] sm:$0xf]  ;;  %v2188_v46 = vld [vmem:[%s3152_s0 + $0x110] sm:$0xf0] }
  0x71   :  { %1109 = vmatmul.bf16.gmra.mxu1 %v1693_v0  ;;  %1158 = vmatmul.bf16.gmra.mxu2 %v1697_v1  ;;  %v1848_v0 = vld [vmem:[%s3152_s0 + $0x208] sm:$0xf]  ;;  %v2223_v1 = vld [vmem:[%s3152_s0 + $0x228] sm:$0xf0] }
  0x72   :  { %v1849_v8 = vor.u32 %v2223_v1, %v1848_v0 }
  0x73   :  { %1207 = vmatmul.bf16.gmra.mxu3 %v1701_v2  ;;  %1256 = vmatmul.bf16.gmra.mxu0 %v1705_v3 }
  0x81   :  { %1114 = vmatmul.bf16.gmra.mxu1 %v1729_v16  ;;  %1163 = vmatmul.bf16.gmra.mxu2 %v1733_v17  ;;  %v1604_v16 = vld [vmem:[%s3152_s0 + $0x18] sm:$0xf]  ;;  %v2161_v17 = vld [vmem:[%s3152_s0 + $0x38] sm:$0xf0] }
  0x82   :  { %v1605_v25 = vor.u32 %v2161_v17, %v1604_v16  ;;  %v1676_v16 = vld [vmem:[%s3152_s0 + $0xa8] sm:$0xf]  ;;  %v2179_v17 = vld [vmem:[%s3152_s0 + $0xc8] sm:$0xf0] }
  0x83   :  { %1212 = vmatmul.bf16.gmra.mxu3 %v1737_v18  ;;  %1261 = vmatmul.bf16.gmra.mxu0 %v1741_v19  ;;  %v2157_v18 = vld [vmem:[%s3152_s0 + $0x1c] sm:$0xf]  ;;  %v1606_v19 = vld [vmem:[%s3152_s0 + $0x3c] sm:$0xf0] }
  0x84   :  { %v1609_v27 = vor.u32 %v2157_v18, %v1606_v19  ;;  %v1678_v18 = vld [vmem:[%s3152_s0 + $0xcc] sm:$0xf0] }
  0x85   :  { %v1684_v19 = vld [vmem:[%s3152_s0 + $0xb0] sm:$0xf] }
  0x91   :  { %1119 = vmatmul.bf16.gmra.mxu1 %v1765_v32  ;;  %1168 = vmatmul.bf16.gmra.mxu2 %v1769_v33 }
  0x93   :  { %1217 = vmatmul.bf16.gmra.mxu3 %v1773_v34  ;;  %1266 = vmatmul.bf16.gmra.mxu0 %v1777_v35 }
  0x9e   :  { %v2821_v50 = vpop.f32.mrf.mxu1 }
  0xa0   :  { %v1046_v53 = vpop.f32.mrf.mxu0 }
  0xa1   :  { %1124 = vmatmul.bf16.gmra.mxu1 %v1801_v48  ;;  %1173 = vmatmul.bf16.gmra.mxu2 %v1805_v49 }
  0xa3   :  { %1222 = vmatmul.bf16.gmra.mxu3 %v1809_v51  ;;  %1271 = vmatmul.bf16.gmra.mxu0 %v1813_v52  ;;  %v1637_v51 = vor.u32 %v2165_v38, %v1634_v39  ;;  %v1641_v52 = vor.u32 %v2170_v42, %v1640_v41 }
  0xa4   :  { %v2823_v54 = vpop.f32.mrf.mxu2 }
  0xa6   :  { %v2825_v55 = vpop.f32.mrf.mxu3  ;;  %v2827_v56 = vpop.f32.mrf.mxu1 }
  0xa8   :  { %v1048_v57 = vpop.f32.mrf.mxu0 }
  0xac   :  { %v2853_v2 = vpop.f32.mrf.mxu2 }
  0xae   :  { %v2855_v3 = vpop.f32.mrf.mxu3  ;;  %v2857_v6 = vpop.f32.mrf.mxu1 }
  0xb0   :  { %v1051_v9 = vpop.f32.mrf.mxu0 }
  0xb1   :  { %1129 = vmatmul.bf16.gmra.mxu1 %v1837_v4  ;;  %1178 = vmatmul.bf16.gmra.mxu2 %v1841_v5 }
  0xb3   :  { %1227 = vmatmul.bf16.gmra.mxu3 %v1845_v7  ;;  %1276 = vmatmul.bf16.gmra.mxu0 %v1849_v8 }
  0xb4   :  { %v2859_v10 = vpop.f32.mrf.mxu2 }
  0xb6   :  { %v2861_v11 = vpop.f32.mrf.mxu3  ;;  %v2863_v12 = vpop.f32.mrf.mxu1 }
  0xb8   :  { %v1053_v13 = vpop.f32.mrf.mxu0 }
  0xbc   :  { %v2889_v22 = vpop.f32.mrf.mxu2 }
  0xbe   :  { %v2891_v23 = vpop.f32.mrf.mxu3  ;;  %v1095_v26 = vpop.f32.mrf.mxu1 }
  0xbf   :  { %v1096_v29 = vadd.f32 %v1095_v26, %v1046_v53 }
  0xc0   :  { %v1242_v30 = vpop.f32.mrf.mxu0 }
  0xc1   :  { %1290 = vmatmul.bf16.vlgmr.msra.gmra.mxu1 %v1601_v24  ;;  %1339 = vmatmul.bf16.vlgmr.msra.gmra.mxu2 %v1605_v25 }
  0xc3   :  { %1388 = vmatmul.bf16.vlgmr.msra.gmra.mxu3 %v1609_v27  ;;  %1437 = vmatmul.bf16.vlgmr.msra.gmra.mxu0 %v1613_v28  ;;  %v1677_v27 = vor.u32 %v2179_v17, %v1676_v16 }
  0xc4   :  { %v1144_v31 = vpop.f32.mrf.mxu2 }
  0xc5   :  { %v1145_v32 = vadd.f32 %v1144_v31, %v1096_v29 }
  0xc6   :  { %v1193_v33 = vpop.f32.mrf.mxu3  ;;  %v1097_v34 = vpop.f32.mrf.mxu1 }
  0xc7   :  { %v1194_v35 = vadd.f32 %v1193_v33, %v1145_v32  ;;  %v1098_v36 = vadd.f32 %v1097_v34, %v1048_v57  ;;  %v1645_v57 = vor.u32 %v2166_v43, %v1642_v44  ;;  %v2183_v43 = vld [vmem:[%s3152_s0 + $0xec] sm:$0xf] }
  0xc8   :  { %v1244_v37 = vpop.f32.mrf.mxu0 }
  0xc9   :  { %v2899_v40 = vadd.f32 %v1242_v30, %v1194_v35  ;;  %v1685_v30 = vor.u32 %v2180_v20, %v1684_v19  ;;  %v1748_v19 = vld [vmem:[%s3152_s0 + $0x138] sm:$0xf]  ;;  %v2197_v20 = vld [vmem:[%s3152_s0 + $0x158] sm:$0xf0] }
  0xcc   :  { %v1146_v47 = vpop.f32.mrf.mxu2 }
  0xcd   :  { %v1147_v48 = vadd.f32 %v1146_v47, %v1098_v36  ;;  %v1714_v47 = vld [vmem:[%s3152_s0 + $0x114] sm:$0xf0] }
  0xce   :  { %v1195_v49 = vpop.f32.mrf.mxu3  ;;  %v1100_v53 = vpop.f32.mrf.mxu1 }
  0xcf   :  { %v1196_v59 = vadd.f32 %v1195_v49, %v1147_v48  ;;  %v1101_v60 = vadd.f32 %v1100_v53, %v1051_v9  ;;  %v1670_v9 = vld [vmem:[%s3152_s0 + $0xc4] sm:$0xf0]  ;;  %v1720_v48 = vld [vmem:[%s3152_s0 + $0xf8] sm:$0xf]  ;;  %v2189_v49 = vld [vmem:[%s3152_s0 + $0x118] sm:$0xf0] }
  0xd0   :  { %v1247_v61 = vpop.f32.mrf.mxu0  ;;  %v1673_v26 = vor.u32 %v2174_v14, %v1670_v9 }
  0xd1   :  { %1295 = vmatmul.bf16.gmra.mxu1 %v1637_v51  ;;  %1344 = vmatmul.bf16.gmra.mxu2 %v1641_v52  ;;  %v2919_v62 = vadd.f32 %v1244_v37, %v1196_v59 }
  0xd3   :  { %1393 = vmatmul.bf16.gmra.mxu3 %v1645_v57  ;;  %1442 = vmatmul.bf16.gmra.mxu0 %v1649_v58  ;;  %v1713_v58 = vor.u32 %v2188_v46, %v1712_v45  ;;  %v2201_v46 = vld [vmem:[%s3152_s0 + $0x17c] sm:$0xf] }
  0xd4   :  { %v1149_v63 = vpop.f32.mrf.mxu2 }
  0xd5   :  { %v1150_v0 = vadd.f32 %v1149_v63, %v1101_v60 }
  0xd6   :  { %v1198_v1 = vpop.f32.mrf.mxu3  ;;  %v1102_v4 = vpop.f32.mrf.mxu1 }
  0xd7   :  { %v1199_v5 = vadd.f32 %v1198_v1, %v1150_v0  ;;  %v1103_v7 = vadd.f32 %v1102_v4, %v1053_v13  ;;  %v2175_v13 = vld [vmem:[%s3152_s0 + $0xac] sm:$0xf] }
  0xd8   :  { %v1249_v8 = vpop.f32.mrf.mxu0  ;;  %v1681_v29 = vor.u32 %v2175_v13, %v1678_v18  ;;  %v2192_v13 = vld [vmem:[%s3152_s0 + $0x134] sm:$0xf] }
  0xd9   :  { %v2927_v15 = vadd.f32 %v1247_v61, %v1199_v5  ;;  %v1721_v61 = vor.u32 %v2189_v49, %v1720_v48  ;;  %v2206_v48 = vld [vmem:[%s3152_s0 + $0x1a0] sm:$0xf0] }
  0xda   :  { %v2202_v49 = vld [vmem:[%s3152_s0 + $0x184] sm:$0xf] }
  0xdc   :  { %v1151_v21 = vpop.f32.mrf.mxu2 }
  0xdd   :  { %v1152_v24 = vadd.f32 %v1151_v21, %v1103_v7  ;;  %v1750_v21 = vld [vmem:[%s3152_s0 + $0x15c] sm:$0xf0] }
  0xde   :  { %v1200_v25 = vpop.f32.mrf.mxu3  ;;  %v1105_v28 = vpop.f32.mrf.mxu1 }
  0xdf   :  { %v1201_v31 = vadd.f32 %v1200_v25, %v1152_v24  ;;  %v1106_v32 = vadd.f32 %v1105_v28, %v2821_v50  ;;  %v1706_v50 = vld [vmem:[%s3152_s0 + $0x10c] sm:$0xf0]  ;;  %v1756_v24 = vld [vmem:[%s3152_s0 + $0x140] sm:$0xf]  ;;  %v2198_v25 = vld [vmem:[%s3152_s0 + $0x160] sm:$0xf0] }
  0xe0   :  { %v1252_v33 = vpop.f32.mrf.mxu0  ;;  %v1709_v57 = vor.u32 %v2183_v43, %v1706_v50 }
  0xe1   :  { %1300 = vmatmul.bf16.gmra.mxu1 %v1673_v26  ;;  %1349 = vmatmul.bf16.gmra.mxu2 %v1677_v27  ;;  %v2948_v34 = vadd.f32 %v1249_v8, %v1201_v31 }
  0xe3   :  { %1398 = vmatmul.bf16.gmra.mxu3 %v1681_v29  ;;  %1447 = vmatmul.bf16.gmra.mxu0 %v1685_v30  ;;  %v1749_v30 = vor.u32 %v2197_v20, %v1748_v19  ;;  %v2210_v20 = vld [vmem:[%s3152_s0 + $0x1c4] sm:$0xf] }
  0xe4   :  { %v1154_v35 = vpop.f32.mrf.mxu2 }
  0xe5   :  { %v1155_v36 = vadd.f32 %v1154_v35, %v1106_v32 }
  0xe6   :  { %v1203_v37 = vpop.f32.mrf.mxu3  ;;  %v1107_v38 = vpop.f32.mrf.mxu1 }
  0xe7   :  { %v1204_v39 = vadd.f32 %v1203_v37, %v1155_v36  ;;  %v1108_v41 = vadd.f32 %v1107_v38, %v2827_v56  ;;  %v2184_v56 = vld [vmem:[%s3152_s0 + $0xf4] sm:$0xf] }
  0xe8   :  { %v1254_v42 = vpop.f32.mrf.mxu0  ;;  %v1717_v60 = vor.u32 %v2184_v56, %v1714_v47  ;;  %v1778_v56 = vld [vmem:[%s3152_s0 + $0x19c] sm:$0xf0] }
  0xe9   :  { %v2957_v44 = vadd.f32 %v1252_v33, %v1204_v39  ;;  %v1757_v33 = vor.u32 %v2198_v25, %v1756_v24  ;;  %v2215_v24 = vld [vmem:[%s3152_s0 + $0x1e8] sm:$0xf0] }
  0xea   :  { %v2211_v25 = vld [vmem:[%s3152_s0 + $0x1cc] sm:$0xf] }
  0xec   :  { %v1156_v51 = vpop.f32.mrf.mxu2 }
  0xed   :  { %v1157_v52 = vadd.f32 %v1156_v51, %v1108_v41 }
  0xee   :  { %v1205_v53 = vpop.f32.mrf.mxu3  ;;  %v1110_v59 = vpop.f32.mrf.mxu1 }
  0xef   :  { %v1206_v63 = vadd.f32 %v1205_v53, %v1157_v52  ;;  %v1111_v0 = vadd.f32 %v1110_v59, %v2857_v6  ;;  %v1742_v6 = vld [vmem:[%s3152_s0 + $0x154] sm:$0xf0]  ;;  %v1786_v52 = vld [vmem:[%s3152_s0 + $0x1a4] sm:$0xf0] }
  0xf0   :  { %v1257_v1 = vpop.f32.mrf.mxu0  ;;  %v1745_v29 = vor.u32 %v2192_v13, %v1742_v6  ;;  %v1792_v53 = vld [vmem:[%s3152_s0 + $0x188] sm:$0xf] }
  0xf1   :  { %1305 = vmatmul.bf16.gmra.mxu1 %v1709_v57  ;;  %1354 = vmatmul.bf16.gmra.mxu2 %v1713_v58  ;;  %v2978_v4 = vadd.f32 %v1254_v42, %v1206_v63  ;;  %v2207_v57 = vld [vmem:[%s3152_s0 + $0x1a8] sm:$0xf0] }
  0xf3   :  { %1403 = vmatmul.bf16.gmra.mxu3 %v1717_v60  ;;  %1452 = vmatmul.bf16.gmra.mxu0 %v1721_v61  ;;  %v1781_v61 = vor.u32 %v2201_v46, %v1778_v56 }
  0xf4   :  { %v1159_v5 = vpop.f32.mrf.mxu2 }
  0xf5   :  { %v1160_v7 = vadd.f32 %v1159_v5, %v1111_v0 }
  0xf6   :  { %v1208_v8 = vpop.f32.mrf.mxu3  ;;  %v1112_v14 = vpop.f32.mrf.mxu1 }
  0xf7   :  { %v1209_v9 = vadd.f32 %v1208_v8, %v1160_v7  ;;  %v1113_v16 = vadd.f32 %v1112_v14, %v2863_v12  ;;  %v2193_v12 = vld [vmem:[%s3152_s0 + $0x13c] sm:$0xf] }
  0xf8   :  { %v1259_v17 = vpop.f32.mrf.mxu0  ;;  %v1753_v32 = vor.u32 %v2193_v12, %v1750_v21  ;;  %v1814_v12 = vld [vmem:[%s3152_s0 + $0x1e4] sm:$0xf0] }
  0xf9   :  { %v2987_v18 = vadd.f32 %v1257_v1, %v1209_v9  ;;  %v1789_v1 = vor.u32 %v2202_v49, %v1786_v52  ;;  %v2219_v49 = vld [vmem:[%s3152_s0 + $0x20c] sm:$0xf] }
  0xfc   :  { %v1161_v26 = vpop.f32.mrf.mxu2 }
  0xfd   :  { %v1162_v27 = vadd.f32 %v1161_v26, %v1113_v16 }
  0xfe   :  { %v1210_v28 = vpop.f32.mrf.mxu3  ;;  %v1115_v31 = vpop.f32.mrf.mxu1 }
  0xff   :  { %v1211_v35 = vadd.f32 %v1210_v28, %v1162_v27  ;;  %v1116_v38 = vadd.f32 %v1115_v31, %v2823_v54  ;;  %v1784_v54 = vld [vmem:[%s3152_s0 + $0x180] sm:$0xf]  ;;  %v1822_v27 = vld [vmem:[%s3152_s0 + $0x1ec] sm:$0xf0] }
 0x100   :  { %v1262_v36 = vpop.f32.mrf.mxu0  ;;  %v1785_v63 = vor.u32 %v2206_v48, %v1784_v54  ;;  %v1828_v28 = vld [vmem:[%s3152_s0 + $0x1d0] sm:$0xf] }
 0x101   :  { %1310 = vmatmul.bf16.gmra.mxu1 %v1745_v29  ;;  %1359 = vmatmul.bf16.gmra.mxu2 %v1749_v30  ;;  %v3007_v37 = vadd.f32 %v1259_v17, %v1211_v35  ;;  %v2216_v29 = vld [vmem:[%s3152_s0 + $0x1f0] sm:$0xf0] }
 0x103   :  { %1408 = vmatmul.bf16.gmra.mxu3 %v1753_v32  ;;  %1457 = vmatmul.bf16.gmra.mxu0 %v1757_v33  ;;  %v1817_v33 = vor.u32 %v2210_v20, %v1814_v12 }
 0x104   :  { %v1164_v39 = vpop.f32.mrf.mxu2 }
 0x105   :  { %v1165_v41 = vadd.f32 %v1164_v39, %v1116_v38  ;;  %v1825_v38 = vor.u32 %v2211_v25, %v1822_v27 }
 0x106   :  { %v1213_v42 = vpop.f32.mrf.mxu3  ;;  %v1117_v43 = vpop.f32.mrf.mxu1 }
 0x107   :  { %v1214_v50 = vadd.f32 %v1213_v42, %v1165_v41  ;;  %v1118_v51 = vadd.f32 %v1117_v43, %v2853_v2  ;;  %v1793_v2 = vor.u32 %v2207_v57, %v1792_v53  ;;  %v2224_v53 = vld [vmem:[%s3152_s0 + $0x230] sm:$0xf0] }
 0x108   :  { %v1264_v45 = vpop.f32.mrf.mxu0  ;;  %v2220_v57 = vld [vmem:[%s3152_s0 + $0x214] sm:$0xf] }
 0x109   :  { %v3016_v47 = vadd.f32 %v1262_v36, %v1214_v50 }
 0x10c   :  { %v1166_v58 = vpop.f32.mrf.mxu2 }
 0x10d   :  { %v1167_v59 = vadd.f32 %v1166_v58, %v1118_v51  ;;  %v1850_v51 = vld [vmem:[%s3152_s0 + $0x22c] sm:$0xf0] }
 0x10e   :  { %v1215_v60 = vpop.f32.mrf.mxu3  ;;  %v1120_v0 = vpop.f32.mrf.mxu1 }
 0x10f   :  { %v1216_v5 = vadd.f32 %v1215_v60, %v1167_v59  ;;  %v1121_v14 = vadd.f32 %v1120_v0, %v2859_v10  ;;  %v1820_v10 = vld [vmem:[%s3152_s0 + $0x1c8] sm:$0xf]  ;;  %v1858_v59 = vld [vmem:[%s3152_s0 + $0x234] sm:$0xf0] }
 0x110   :  { %v1267_v7 = vpop.f32.mrf.mxu0  ;;  %v1821_v35 = vor.u32 %v2215_v24, %v1820_v10  ;;  %v1864_v60 = vld [vmem:[%s3152_s0 + $0x218] sm:$0xf] }
 0x111   :  { %1315 = vmatmul.bf16.gmra.mxu1 %v1781_v61  ;;  %1364 = vmatmul.bf16.gmra.mxu2 %v1785_v63  ;;  %v3037_v8 = vadd.f32 %v1264_v45, %v1216_v5  ;;  %v2225_v61 = vld [vmem:[%s3152_s0 + $0x238] sm:$0xf0] }
 0x113   :  { %1413 = vmatmul.bf16.gmra.mxu3 %v1789_v1  ;;  %1462 = vmatmul.bf16.gmra.mxu0 %v1793_v2  ;;  %v1853_v2 = vor.u32 %v2219_v49, %v1850_v51 }
 0x114   :  { %v1169_v9 = vpop.f32.mrf.mxu2 }
 0x115   :  { %v1170_v16 = vadd.f32 %v1169_v9, %v1121_v14  ;;  %v1861_v14 = vor.u32 %v2220_v57, %v1858_v59 }
 0x116   :  { %v1218_v17 = vpop.f32.mrf.mxu3  ;;  %v1122_v13 = vpop.f32.mrf.mxu1 }
 0x117   :  { %v1219_v6 = vadd.f32 %v1218_v17, %v1170_v16  ;;  %v1123_v26 = vadd.f32 %v1122_v13, %v2889_v22  ;;  %v1829_v22 = vor.u32 %v2216_v29, %v1828_v28 }
 0x118   :  { %v1269_v19 = vpop.f32.mrf.mxu0 }
 0x119   :  { %v3046_v21 = vadd.f32 %v1267_v7, %v1219_v6 }
 0x11c   :  { %v1171_v30 = vpop.f32.mrf.mxu2 }
 0x11d   :  { %v1172_v31 = vadd.f32 %v1171_v30, %v1123_v26 }
 0x11e   :  { %v1220_v32 = vpop.f32.mrf.mxu3  ;;  %v1125_v36 = vpop.f32.mrf.mxu1 }
 0x11f   :  { %v1221_v39 = vadd.f32 %v1220_v32, %v1172_v31  ;;  %v1126_v43 = vadd.f32 %v1125_v36, %v2825_v55  ;;  %v1856_v55 = vld [vmem:[%s3152_s0 + $0x210] sm:$0xf] }
 0x120   :  { %v1272_v41 = vpop.f32.mrf.mxu0  ;;  %v1857_v5 = vor.u32 %v2224_v53, %v1856_v55 }
 0x121   :  { %1320 = vmatmul.bf16.gmra.mxu1 %v1817_v33  ;;  %1369 = vmatmul.bf16.gmra.mxu2 %v1821_v35  ;;  %v3067_v42 = vadd.f32 %v1269_v19, %v1221_v39 }
 0x123   :  { %1418 = vmatmul.bf16.gmra.mxu3 %v1825_v38  ;;  %1467 = vmatmul.bf16.gmra.mxu0 %v1829_v22 }
 0x124   :  { %v1174_v50 = vpop.f32.mrf.mxu2 }
 0x125   :  { %v1175_v45 = vadd.f32 %v1174_v50, %v1126_v43 }
 0x126   :  { %v1223_v46 = vpop.f32.mrf.mxu3  ;;  %v1127_v56 = vpop.f32.mrf.mxu1 }
 0x127   :  { %v1224_v54 = vadd.f32 %v1223_v46, %v1175_v45  ;;  %v1128_v58 = vadd.f32 %v1127_v56, %v2855_v3  ;;  %v1865_v3 = vor.u32 %v2225_v61, %v1864_v60 }
 0x128   :  { %v1274_v48 = vpop.f32.mrf.mxu0 }
 0x129   :  { %v3076_v52 = vadd.f32 %v1272_v41, %v1224_v54 }
 0x12c   :  { %v1176_v63 = vpop.f32.mrf.mxu2 }
 0x12d   :  { %v1177_v0 = vadd.f32 %v1176_v63, %v1128_v58 }
 0x12e   :  { %v1225_v1 = vpop.f32.mrf.mxu3  ;;  %v1130_v7 = vpop.f32.mrf.mxu1 }
 0x12f   :  { %v1226_v9 = vadd.f32 %v1225_v1, %v1177_v0  ;;  %v1131_v13 = vadd.f32 %v1130_v7, %v2861_v11 }
 0x130   :  { %v1277_v16 = vpop.f32.mrf.mxu0 }
 0x131   :  { %1325 = vmatmul.bf16.gmra.mxu1 %v1853_v2  ;;  %1374 = vmatmul.bf16.gmra.mxu2 %v1857_v5  ;;  %v3097_v17 = vadd.f32 %v1274_v48, %v1226_v9 }
 0x133   :  { %1423 = vmatmul.bf16.gmra.mxu3 %v1861_v14  ;;  %1472 = vmatmul.bf16.gmra.mxu0 %v1865_v3 }
 0x134   :  { %v1179_v6 = vpop.f32.mrf.mxu2 }
 0x135   :  { %v1180_v19 = vadd.f32 %v1179_v6, %v1131_v13 }
 0x136   :  { %v1228_v20 = vpop.f32.mrf.mxu3  ;;  %v1132_v12 = vpop.f32.mrf.mxu1 }
 0x137   :  { %v1229_v10 = vadd.f32 %v1228_v20, %v1180_v19  ;;  %v1133_v26 = vadd.f32 %v1132_v12, %v2891_v23 }
 0x138   :  { %v1279_v24 = vpop.f32.mrf.mxu0 }
 0x139   :  { %v3100_v25 = vadd.f32 %v1277_v16, %v1229_v10 }
 0x13c   :  { %v1181_v27 = vpop.f32.mrf.mxu2 }
 0x13d   :  { %v1182_v28 = vadd.f32 %v1181_v27, %v1133_v26 }
 0x13e   :  { %v1230_v29 = vpop.f32.mrf.mxu3  ;;  %v1291_v30 = vpop.f32.mrf.mxu1 }
 0x13f   :  { %v1231_v31 = vadd.f32 %v1230_v29, %v1182_v28  ;;  %v1292_v11 = vadd.f32 %v1291_v30, %v2899_v40 }
 0x140   :  { %v1438_v32 = vpop.f32.mrf.mxu0 }
 0x141   :  { %v3103_v33 = vadd.f32 %v1279_v24, %v1231_v31 }
 0x144   :  { %v1340_v35 = vpop.f32.mrf.mxu2 }
 0x145   :  { %v1341_v38 = vadd.f32 %v1340_v35, %v1292_v11 }
 0x146   :  { %v1389_v36 = vpop.f32.mrf.mxu3  ;;  %v1293_v22 = vpop.f32.mrf.mxu1 }
 0x147   :  { %v1390_v41 = vadd.f32 %v1389_v36, %v1341_v38  ;;  %v1294_v43 = vadd.f32 %v1293_v22, %v2919_v62 }
 0x148   :  { %v1440_v39 = vpop.f32.mrf.mxu0 }
 0x149   :  { %v1439_v46 = vadd.f32 %v1438_v32, %v1390_v41 }
 0x14b   :  { %v1532_v51 = vmul.f32 %v1439_v46, %v1439_v46 }
 0x14c   :  { %v1342_v50 = vpop.f32.mrf.mxu2 }
 0x14d   :  { %v1343_v23 = vadd.f32 %v1342_v50, %v1294_v43 }
 0x14e   :  { %v1391_v45 = vpop.f32.mrf.mxu3  ;;  %v1296_v56 = vpop.f32.mrf.mxu1 }
 0x14f   :  { %v1392_v54 = vadd.f32 %v1391_v45, %v1343_v23  ;;  %v1297_v57 = vadd.f32 %v1296_v56, %v2927_v15 }
 0x150   :  { %v1443_v48 = vpop.f32.mrf.mxu0 }
 0x151   :  { %v1441_v49 = vadd.f32 %v1440_v39, %v1392_v54 }
 0x153   :  { %v2301_v55 = vpack.c.bf16 %v1441_v49, %v1439_v46  ;;  %v1510_v53 = vadd.f32 %v1441_v49, %v1439_v46  ;;  %v1533_v40 = vmul.f32 %v1441_v49, %v1441_v49 }
 0x154   :  { %v1345_v58 = vpop.f32.mrf.mxu2 }
 0x155   :  { %2302 = vst [vmem:[%s3153_s2] sm:$0xff] %v2301_v55   ;;  %v1548_v62 = vadd.f32 %v1533_v40, %v1532_v51  ;;  %v1346_v59 = vadd.f32 %v1345_v58, %v1297_v57 }
 0x156   :  { %v1394_v60 = vpop.f32.mrf.mxu3  ;;  %v1298_v61 = vpop.f32.mrf.mxu1 }
 0x157   :  { %v1395_v63 = vadd.f32 %v1394_v60, %v1346_v59  ;;  %v1299_v7 = vadd.f32 %v1298_v61, %v2948_v34 }
 0x158   :  { %v1445_v0 = vpop.f32.mrf.mxu0 }
 0x159   :  { %v1444_v1 = vadd.f32 %v1443_v48, %v1395_v63 }
 0x15b   :  { %v1511_v2 = vadd.f32 %v1510_v53, %v1444_v1  ;;  %v1534_v5 = vmul.f32 %v1444_v1, %v1444_v1 }
 0x15c   :  { %v1347_v14 = vpop.f32.mrf.mxu2 }
 0x15d   :  { %v1549_v3 = vadd.f32 %v1548_v62, %v1534_v5  ;;  %v1348_v9 = vadd.f32 %v1347_v14, %v1299_v7 }
 0x15e   :  { %v1396_v15 = vpop.f32.mrf.mxu3  ;;  %v1301_v16 = vpop.f32.mrf.mxu1 }
 0x15f   :  { %v1397_v13 = vadd.f32 %v1396_v15, %v1348_v9  ;;  %v1302_v24 = vadd.f32 %v1301_v16, %v2957_v44 }
 0x160   :  { %v1448_v6 = vpop.f32.mrf.mxu0 }
 0x161   :  { %v1446_v19 = vadd.f32 %v1445_v0, %v1397_v13 }
 0x163   :  { %v2306_v20 = vpack.c.bf16 %v1446_v19, %v1444_v1  ;;  %v1512_v12 = vadd.f32 %v1511_v2, %v1446_v19  ;;  %v1535_v10 = vmul.f32 %v1446_v19, %v1446_v19 }
 0x164   :  { %v1350_v26 = vpop.f32.mrf.mxu2 }
 0x165   :  { %2338 = vst [vmem:[%s3153_s2 + $0x8] sm:$0xff] %v2306_v20   ;;  %v1550_v27 = vadd.f32 %v1549_v3, %v1535_v10  ;;  %v1351_v34 = vadd.f32 %v1350_v26, %v1302_v24 }
 0x166   :  { %v1399_v28 = vpop.f32.mrf.mxu3  ;;  %v1303_v29 = vpop.f32.mrf.mxu1 }
 0x167   :  { %v1400_v30 = vadd.f32 %v1399_v28, %v1351_v34  ;;  %v1304_v36 = vadd.f32 %v1303_v29, %v2978_v4 }
 0x168   :  { %v1450_v31 = vpop.f32.mrf.mxu0 }
 0x169   :  { %v1449_v32 = vadd.f32 %v1448_v6, %v1400_v30 }
 0x16b   :  { %v1513_v11 = vadd.f32 %v1512_v12, %v1449_v32  ;;  %v1536_v35 = vmul.f32 %v1449_v32, %v1449_v32 }
 0x16c   :  { %v1352_v38 = vpop.f32.mrf.mxu2 }
 0x16d   :  { %v1551_v22 = vadd.f32 %v1550_v27, %v1536_v35  ;;  %v1353_v39 = vadd.f32 %v1352_v38, %v1304_v36 }
 0x16e   :  { %v1401_v44 = vpop.f32.mrf.mxu3  ;;  %v1306_v41 = vpop.f32.mrf.mxu1 }
 0x16f   :  { %v1402_v43 = vadd.f32 %v1401_v44, %v1353_v39  ;;  %v1307_v54 = vadd.f32 %v1306_v41, %v2987_v18 }
 0x170   :  { %v1453_v50 = vpop.f32.mrf.mxu0 }
 0x171   :  { %v1451_v23 = vadd.f32 %v1450_v31, %v1402_v43 }
 0x173   :  { %v2311_v45 = vpack.c.bf16 %v1451_v23, %v1449_v32  ;;  %v1514_v46 = vadd.f32 %v1513_v11, %v1451_v23  ;;  %v1537_v56 = vmul.f32 %v1451_v23, %v1451_v23 }
 0x174   :  { %v1355_v48 = vpop.f32.mrf.mxu2 }
 0x175   :  { %2339 = vst [vmem:[%s3153_s2 + $0x10] sm:$0xff] %v2311_v45   ;;  %v1552_v49 = vadd.f32 %v1551_v22, %v1537_v56  ;;  %v1356_v4 = vadd.f32 %v1355_v48, %v1307_v54 }
 0x176   :  { %v1404_v51 = vpop.f32.mrf.mxu3  ;;  %v1308_v55 = vpop.f32.mrf.mxu1 }
 0x177   :  { %v1405_v53 = vadd.f32 %v1404_v51, %v1356_v4  ;;  %v1309_v59 = vadd.f32 %v1308_v55, %v3007_v37 }
 0x178   :  { %v1455_v40 = vpop.f32.mrf.mxu0 }
 0x179   :  { %v1454_v57 = vadd.f32 %v1453_v50, %v1405_v53 }
 0x17b   :  { %v1515_v58 = vadd.f32 %v1514_v46, %v1454_v57  ;;  %v1538_v62 = vmul.f32 %v1454_v57, %v1454_v57 }
 0x17c   :  { %v1357_v60 = vpop.f32.mrf.mxu2 }
 0x17d   :  { %v1553_v61 = vadd.f32 %v1552_v49, %v1538_v62  ;;  %v1358_v63 = vadd.f32 %v1357_v60, %v1309_v59 }
 0x17e   :  { %v1406_v18 = vpop.f32.mrf.mxu3  ;;  %v1311_v0 = vpop.f32.mrf.mxu1 }
 0x17f   :  { %v1407_v1 = vadd.f32 %v1406_v18, %v1358_v63  ;;  %v1312_v9 = vadd.f32 %v1311_v0, %v3016_v47 }
 0x180   :  { %v1458_v2 = vpop.f32.mrf.mxu0 }
 0x181   :  { %v1456_v5 = vadd.f32 %v1455_v40, %v1407_v1 }
 0x183   :  { %v2316_v7 = vpack.c.bf16 %v1456_v5, %v1454_v57  ;;  %v1516_v14 = vadd.f32 %v1515_v58, %v1456_v5  ;;  %v1539_v3 = vmul.f32 %v1456_v5, %v1456_v5 }
 0x184   :  { %v1360_v15 = vpop.f32.mrf.mxu2 }
 0x185   :  { %2340 = vst [vmem:[%s3153_s2 + $0x18] sm:$0xff] %v2316_v7   ;;  %v1554_v16 = vadd.f32 %v1553_v61, %v1539_v3  ;;  %v1361_v37 = vadd.f32 %v1360_v15, %v1312_v9 }
 0x186   :  { %v1409_v13 = vpop.f32.mrf.mxu3  ;;  %v1313_v6 = vpop.f32.mrf.mxu1 }
 0x187   :  { %v1410_v19 = vadd.f32 %v1409_v13, %v1361_v37  ;;  %v1314_v26 = vadd.f32 %v1313_v6, %v3037_v8 }
 0x188   :  { %v1460_v20 = vpop.f32.mrf.mxu0 }
 0x189   :  { %v1459_v12 = vadd.f32 %v1458_v2, %v1410_v19 }
 0x18b   :  { %v1517_v10 = vadd.f32 %v1516_v14, %v1459_v12  ;;  %v1540_v24 = vmul.f32 %v1459_v12, %v1459_v12 }
 0x18c   :  { %v1362_v27 = vpop.f32.mrf.mxu2 }
 0x18d   :  { %v1555_v34 = vadd.f32 %v1554_v16, %v1540_v24  ;;  %v1363_v28 = vadd.f32 %v1362_v27, %v1314_v26 }
 0x18e   :  { %v1411_v47 = vpop.f32.mrf.mxu3  ;;  %v1316_v29 = vpop.f32.mrf.mxu1 }
 0x18f   :  { %v1412_v30 = vadd.f32 %v1411_v47, %v1363_v28  ;;  %v1317_v38 = vadd.f32 %v1316_v29, %v3046_v21 }
 0x190   :  { %v1463_v31 = vpop.f32.mrf.mxu0 }
 0x191   :  { %v1461_v32 = vadd.f32 %v1460_v20, %v1412_v30 }
 0x193   :  { %v2321_v11 = vpack.c.bf16 %v1461_v32, %v1459_v12  ;;  %v1518_v35 = vadd.f32 %v1517_v10, %v1461_v32  ;;  %v1541_v36 = vmul.f32 %v1461_v32, %v1461_v32 }
 0x194   :  { %v1365_v22 = vpop.f32.mrf.mxu2 }
 0x195   :  { %2341 = vst [vmem:[%s3153_s2 + $0x20] sm:$0xff] %v2321_v11   ;;  %v1556_v39 = vadd.f32 %v1555_v34, %v1541_v36  ;;  %v1366_v8 = vadd.f32 %v1365_v22, %v1317_v38 }
 0x196   :  { %v1414_v44 = vpop.f32.mrf.mxu3  ;;  %v1318_v41 = vpop.f32.mrf.mxu1 }
 0x197   :  { %v1415_v43 = vadd.f32 %v1414_v44, %v1366_v8  ;;  %v1319_v56 = vadd.f32 %v1318_v41, %v3067_v42 }
 0x198   :  { %v1465_v50 = vpop.f32.mrf.mxu0 }
 0x199   :  { %v1464_v23 = vadd.f32 %v1463_v31, %v1415_v43 }
 0x19b   :  { %v1519_v45 = vadd.f32 %v1518_v35, %v1464_v23  ;;  %v1542_v46 = vmul.f32 %v1464_v23, %v1464_v23 }
 0x19c   :  { %v1367_v54 = vpop.f32.mrf.mxu2 }
 0x19d   :  { %v1557_v48 = vadd.f32 %v1556_v39, %v1542_v46  ;;  %v1368_v49 = vadd.f32 %v1367_v54, %v1319_v56 }
 0x19e   :  { %v1416_v21 = vpop.f32.mrf.mxu3  ;;  %v1321_v4 = vpop.f32.mrf.mxu1 }
 0x19f   :  { %v1417_v51 = vadd.f32 %v1416_v21, %v1368_v49  ;;  %v1322_v62 = vadd.f32 %v1321_v4, %v3076_v52 }
 0x1a0   :  { %v1468_v53 = vpop.f32.mrf.mxu0 }
 0x1a1   :  { %v1466_v55 = vadd.f32 %v1465_v50, %v1417_v51 }
 0x1a3   :  { %v2326_v40 = vpack.c.bf16 %v1466_v55, %v1464_v23  ;;  %v1520_v57 = vadd.f32 %v1519_v45, %v1466_v55  ;;  %v1543_v58 = vmul.f32 %v1466_v55, %v1466_v55 }
 0x1a4   :  { %v1370_v59 = vpop.f32.mrf.mxu2 }
 0x1a5   :  { %2342 = vst [vmem:[%s3153_s2 + $0x28] sm:$0xff] %v2326_v40   ;;  %v1558_v60 = vadd.f32 %v1557_v48, %v1543_v58  ;;  %v1371_v42 = vadd.f32 %v1370_v59, %v1322_v62 }
 0x1a6   :  { %v1419_v61 = vpop.f32.mrf.mxu3  ;;  %v1323_v63 = vpop.f32.mrf.mxu1 }
 0x1a7   :  { %v1420_v18 = vadd.f32 %v1419_v61, %v1371_v42  ;;  %v1324_v5 = vadd.f32 %v1323_v63, %v3097_v17 }
 0x1a8   :  { %v1470_v7 = vpop.f32.mrf.mxu0 }
 0x1a9   :  { %v1469_v0 = vadd.f32 %v1468_v53, %v1420_v18 }
 0x1ab   :  { %v1521_v1 = vadd.f32 %v1520_v57, %v1469_v0  ;;  %v1544_v2 = vmul.f32 %v1469_v0, %v1469_v0 }
 0x1ac   :  { %v1372_v14 = vpop.f32.mrf.mxu2 }
 0x1ad   :  { %v1559_v3 = vadd.f32 %v1558_v60, %v1544_v2  ;;  %v1373_v9 = vadd.f32 %v1372_v14, %v1324_v5 }
 0x1ae   :  { %v1421_v52 = vpop.f32.mrf.mxu3  ;;  %v1326_v15 = vpop.f32.mrf.mxu1 }
 0x1af   :  { %v1422_v16 = vadd.f32 %v1421_v52, %v1373_v9  ;;  %v1327_v20 = vadd.f32 %v1326_v15, %v3100_v25 }
 0x1b0   :  { %v1473_v26 = vpop.f32.mrf.mxu0 }
 0x1b1   :  { %v1471_v37 = vadd.f32 %v1470_v7, %v1422_v16 }
 0x1b3   :  { %v2331_v13 = vpack.c.bf16 %v1471_v37, %v1469_v0  ;;  %v1522_v6 = vadd.f32 %v1521_v1, %v1471_v37  ;;  %v1545_v19 = vmul.f32 %v1471_v37, %v1471_v37 }
 0x1b4   :  { %v1375_v12 = vpop.f32.mrf.mxu2 }
 0x1b5   :  { %2343 = vst [vmem:[%s3153_s2 + $0x30] sm:$0xff] %v2331_v13   ;;  %v1560_v10 = vadd.f32 %v1559_v3, %v1545_v19  ;;  %v1376_v17 = vadd.f32 %v1375_v12, %v1327_v20 }
 0x1b6   :  { %v1424_v24 = vpop.f32.mrf.mxu3  ;;  %v1328_v34 = vpop.f32.mrf.mxu1 }
 0x1b7   :  { %v1425_v27 = vadd.f32 %v1424_v24, %v1376_v17  ;;  %v1329_v30 = vadd.f32 %v1328_v34, %v3103_v33 }
 0x1b8   :  { %v1475_v36 = vpop.f32.mrf.mxu0 }
 0x1b9   :  { %v1474_v28 = vadd.f32 %v1473_v26, %v1425_v27 }
 0x1bb   :  { %v1523_v47 = vadd.f32 %v1522_v6, %v1474_v28  ;;  %v1546_v29 = vmul.f32 %v1474_v28, %v1474_v28 }
 0x1bc   :  { %v1377_v31 = vpop.f32.mrf.mxu2 }
 0x1bd   :  { %v1561_v32 = vadd.f32 %v1560_v10, %v1546_v29  ;;  %v1378_v11 = vadd.f32 %v1377_v31, %v1329_v30 }
 0x1be   :  { %v1426_v25 = vpop.f32.mrf.mxu3 }
 0x1bf   :  { %v1427_v35 = vadd.f32 %v1426_v25, %v1378_v11 }
 0x1c1   :  { %v1476_v38 = vadd.f32 %v1475_v36, %v1427_v35 }
 0x1c3   :  { %v2336_v22 = vpack.c.bf16 %v1476_v38, %v1474_v28  ;;  %v1524_v39 = vadd.f32 %v1523_v47, %v1476_v38  ;;  %v1547_v8 = vmul.f32 %v1476_v38, %v1476_v38 }
 0x1c5   :  { %2344 = vst [vmem:[%s3153_s2 + $0x38] sm:$0xff] %v2336_v22   ;;  %v1525_v44 = vrot.slane %v1524_v39, 4  ;;  %v1562_v41 = vadd.f32 %v1561_v32, %v1547_v8 }
 0x1c7   :  { %v1526_v43 = vadd.f32 %v1525_v44, %v1524_v39  ;;  %v1563_v50 = vrot.slane %v1562_v41, 4 }
 0x1c9   :  { %v1527_v23 = vrot.slane %v1526_v43, 2  ;;  %v1564_v33 = vadd.f32 %v1563_v50, %v1562_v41 }
 0x1cb   :  { %v1528_v45 = vadd.f32 %v1527_v23, %v1526_v43  ;;  %v1565_v46 = vrot.slane %v1564_v33, 2 }
 0x1cd   :  { %v1529_v56 = vrot.slane %v1528_v45, 1  ;;  %v1566_v54 = vadd.f32 %v1565_v46, %v1564_v33 }
 0x1cf   :  { %v1530_v48 = vadd.f32 %v1529_v56, %v1528_v45  ;;  %v1567_v49 = vrot.slane %v1566_v54, 1 }
 0x1d1   :  { %1531 = vst [vmem:[%s3154_s3] sm:$0x1] %v1530_v48  ;;  %v1568_v21 = vadd.f32 %v1567_v49, %v1566_v54 }
 0x1d3   :  { %1569 = vst [vmem:[%s3154_s3 + $0x1] sm:$0x1] %v1568_v21 }

</bundles_post_ra>
